<compile_context>
chip_gen: v7x
topology: tpu7x:2x2x1
jax: 0.10.0
libtpu: 0.0.40
codegen_flags: <defaults>
</compile_context>

<pallas_src>
import functools

import jax
import jax.numpy as jnp
from jax.experimental import pallas as pl
from jax.experimental.pallas import tpu as pltpu

LN_EPS = 1e-5  # torch.nn.LayerNorm default


def _round_up(x, m):
    return ((x + m - 1) // m) * m


def _layernorm(h, gamma, beta):
    # Two-pass form: var = E[(h - mu)^2].  Robust when |mu| >> sigma, and
    # matches torch.nn.LayerNorm (biased variance).
    mu = jnp.mean(h, axis=-1, keepdims=True)
    d = h - mu
    var = jnp.mean(d * d, axis=-1, keepdims=True)
    return d * jax.lax.rsqrt(var + LN_EPS) * gamma + beta


def mlp_kernel(x_ref, w1_ref, b1_ref, g1_ref, be1_ref,
               w2_ref, b2_ref, g2_ref, be2_ref, o_ref):
    # linear1 (MXU, f32 accumulate) -> LayerNorm -> ReLU
    h = jnp.dot(x_ref[...], w1_ref[...], preferred_element_type=jnp.float32)
    h = h + b1_ref[...]
    h = _layernorm(h, g1_ref[...], be1_ref[...])
    h = jnp.maximum(h, 0.0)

    # linear2 -> LayerNorm -> ReLU
    y = jnp.dot(h, w2_ref[...], preferred_element_type=jnp.float32)
    y = y + b2_ref[...]
    y = _layernorm(y, g2_ref[...], be2_ref[...])
    y = jnp.maximum(y, 0.0)

    o_ref[...] = y.astype(o_ref.dtype)


@functools.partial(jax.jit, static_argnames=("block_m", "num_cores", "out_dtype"))
def mlp_forward(x, params, block_m=4096, num_cores=1, out_dtype=jnp.float32):
    """x: (B, input_size) float32. params: dict from init_mlp_params.

    block_m: batch tile (rows per grid step); big values amortize the fixed
             per-step pipeline overhead.  At block_m=4096 peak VMEM is only a
             few MB, so no vmem_limit_bytes override is needed anywhere; for
             8K-16K tiles on v5e raise pltpu.CompilerParams(vmem_limit_bytes=).
    num_cores: TensorCores per chip (2 on v7x).  Only then is the tile capped
             so the grid keeps >= num_cores parallel steps.
    """
    B, in_size = x.shape
    hidden = params["w1"].shape[1]
    out_size = params["w2"].shape[1]

    # Pick the batch tile.
    bm = block_m
    if num_cores > 1:
        # Keep >= num_cores grid steps so every TensorCore gets work.
        bm = min(bm, max(8, _round_up(pl.cdiv(B, num_cores), 8)))
    if bm >= B:
        bm = B                    # single step; full-dim block needs no rounding
    else:
        bm = _round_up(bm, 8)     # (8,128) block-shape constraint

    grid = (pl.cdiv(B, bm),)      # ragged last block handled by Mosaic:
                                  # OOB input rows are never written back.

    # Constant-index specs: DMA'd once, resident in VMEM for the whole grid.
    const = lambda r, c: pl.BlockSpec((r, c), lambda i: (0, 0))

    out = pl.pallas_call(
        mlp_kernel,
        out_shape=jax.ShapeDtypeStruct((B, out_size), out_dtype),
        grid_spec=pltpu.PrefetchScalarGridSpec(
            num_scalar_prefetch=0,
            grid=grid,
            in_specs=[
                pl.BlockSpec((bm, in_size), lambda i: (i, 0)),  # x (streamed)
                const(in_size, hidden),    # w1
                const(1, hidden),          # b1
                const(1, hidden),          # ln1 gamma
                const(1, hidden),          # ln1 beta
                const(hidden, out_size),   # w2
                const(1, out_size),        # b2
                const(1, out_size),        # ln2 gamma
                const(1, out_size),        # ln2 beta
            ],
            out_specs=pl.BlockSpec((bm, out_size), lambda i: (i, 0)),
        ),
        compiler_params=pltpu.CompilerParams(
            dimension_semantics=("parallel",)),
    )(x, params["w1"], params["b1"], params["g1"], params["be1"],
      params["w2"], params["b2"], params["g2"], params["be2"])

    return out


def kaiming_uniform(key, fan_out, fan_in):
    # torch.nn.init.kaiming_uniform_ defaults (as called in MLP._init_weights):
    # a=0 -> gain=sqrt(2), bound = gain * sqrt(3 / fan_in); shape (out, in).
    bound = jnp.sqrt(2.0) * jnp.sqrt(3.0 / fan_in)
    return jax.random.uniform(key, (fan_out, fan_in), jnp.float32,
                              minval=-bound, maxval=bound)


def init_mlp_params(key, input_size, output_size, hidden_size=64):
    k1, k2 = jax.random.split(key)
    w1 = kaiming_uniform(k1, hidden_size, input_size)   # torch layout (out, in)
    w2 = kaiming_uniform(k2, output_size, hidden_size)
    return {
        # Pre-transposed to (in, out); kept f32 to match the PyTorch module.
        "w1": w1.T,
        "b1": jnp.full((1, hidden_size), 0.01, jnp.float32),
        "g1": jnp.ones((1, hidden_size), jnp.float32),    # LayerNorm weight
        "be1": jnp.zeros((1, hidden_size), jnp.float32),  # LayerNorm bias
        "w2": w2.T,
        "b2": jnp.full((1, output_size), 0.01, jnp.float32),
        "g2": jnp.ones((1, output_size), jnp.float32),
        "be2": jnp.zeros((1, output_size), jnp.float32),
    }


def mlp_reference(x, p):
    """Pure-JAX reference: same math as the PyTorch module (f32 throughout)."""
    def ln(h, g, b):
        mu = h.mean(-1, keepdims=True)
        d = h - mu
        var = (d * d).mean(-1, keepdims=True)
        return d * jax.lax.rsqrt(var + LN_EPS) * g + b

    h = jnp.dot(x, p["w1"], preferred_element_type=jnp.float32) + p["b1"]
    h = jnp.maximum(ln(h, p["g1"], p["be1"]), 0.0)
    y = jnp.dot(h, p["w2"], preferred_element_type=jnp.float32) + p["b2"]
    y = jnp.maximum(ln(y, p["g2"], p["be2"]), 0.0)
    return y


if __name__ == "__main__":
    input_size, hidden_size, output_size = 32, 64, 32
    batch = 200  # deliberately not a multiple of any tile size

    key = jax.random.PRNGKey(0)
    kx, kp = jax.random.split(key)
    x = jax.random.normal(kx, (batch, input_size), jnp.float32)
    params = init_mlp_params(kp, input_size, output_size, hidden_size)

    ref = mlp_reference(x, params)

    # Default: single-TC heuristic -> one full-batch grid step, no padding.
    out = jax.block_until_ready(mlp_forward(x, params))
    assert out.shape == (batch, output_size)
    assert jnp.allclose(out, ref, atol=1e-2, rtol=1e-2), "mismatch vs reference"

    # v7x-style call: 2 TensorCores -> tile capped to ceil(B/2), 2-step grid.
    out_2c = jax.block_until_ready(mlp_forward(x, params, num_cores=2))
    assert jnp.allclose(out_2c, ref, atol=1e-2, rtol=1e-2), "2-core path mismatch"

    # Small explicit tile: 4-step grid with a ragged (8-row) final block.
    out_small = jax.block_until_ready(mlp_forward(x, params, block_m=64))
    assert jnp.allclose(out_small, ref, atol=1e-2, rtol=1e-2), "ragged-tail mismatch"

    # Optional bf16 output (cuts the dominant output HBM stream ~2x).
    out_bf16 = jax.block_until_ready(
        mlp_forward(x, params, out_dtype=jnp.bfloat16))
    assert jnp.allclose(out_bf16.astype(jnp.float32), ref, atol=5e-2, rtol=5e-2), \
        "bf16-output mismatch"

    print("KERNEL_OK")
</pallas_src>

<mosaic_0001>
module attributes {stable_mosaic.version = 11 : i64} {
  func.func @mlp_kernel(%arg0: i32, %arg1: memref<200x32xf32, #tpu.memory_space<vmem>>, %arg2: memref<32x64xf32, #tpu.memory_space<vmem>>, %arg3: memref<1x64xf32, #tpu.memory_space<vmem>>, %arg4: memref<1x64xf32, #tpu.memory_space<vmem>>, %arg5: memref<1x64xf32, #tpu.memory_space<vmem>>, %arg6: memref<64x32xf32, #tpu.memory_space<vmem>>, %arg7: memref<1x32xf32, #tpu.memory_space<vmem>>, %arg8: memref<1x32xf32, #tpu.memory_space<vmem>>, %arg9: memref<1x32xf32, #tpu.memory_space<vmem>>, %arg10: memref<200x32xf32, #tpu.memory_space<vmem>>) attributes {dimension_semantics = [#tpu.dimension_semantics<parallel>], iteration_bounds = array<i64: 1>, scalar_prefetch = 0 : i64, scratch_operands = 0 : i64, tpu.core_type = #tpu.core_type<tc>, window_params = [{transform_indices = @transform_0, window_bounds = array<i64: 200, 32>}, {pipeline_mode = #tpu.pipeline_mode<synchronous>, transform_indices = @transform_1, window_bounds = array<i64: 32, 64>}, {pipeline_mode = #tpu.pipeline_mode<synchronous>, transform_indices = @transform_2, window_bounds = array<i64: 1, 64>}, {pipeline_mode = #tpu.pipeline_mode<synchronous>, transform_indices = @transform_3, window_bounds = array<i64: 1, 64>}, {pipeline_mode = #tpu.pipeline_mode<synchronous>, transform_indices = @transform_4, window_bounds = array<i64: 1, 64>}, {pipeline_mode = #tpu.pipeline_mode<synchronous>, transform_indices = @transform_5, window_bounds = array<i64: 64, 32>}, {pipeline_mode = #tpu.pipeline_mode<synchronous>, transform_indices = @transform_6, window_bounds = array<i64: 1, 32>}, {pipeline_mode = #tpu.pipeline_mode<synchronous>, transform_indices = @transform_7, window_bounds = array<i64: 1, 32>}, {pipeline_mode = #tpu.pipeline_mode<synchronous>, transform_indices = @transform_8, window_bounds = array<i64: 1, 32>}, {transform_indices = @transform_9, window_bounds = array<i64: 200, 32>}]} {
    %c0 = arith.constant 0 : index
    %c0_0 = arith.constant 0 : index
    %0 = vector.load %arg1[%c0, %c0_0] : memref<200x32xf32, #tpu.memory_space<vmem>>, vector<200x32xf32>
    %c0_1 = arith.constant 0 : index
    %c0_2 = arith.constant 0 : index
    %1 = vector.load %arg2[%c0_1, %c0_2] : memref<32x64xf32, #tpu.memory_space<vmem>>, vector<32x64xf32>
    %cst = arith.constant dense<0.000000e+00> : vector<200x64xf32>
    %2 = tpu.matmul %0, %1, %cst {dimension_numbers = #tpu.dot_dimension_numbers<[1], [0], [0], [1], [0, 0, 1, 1], [], []>} : vector<200x32xf32>, vector<32x64xf32>, vector<200x64xf32> -> vector<200x64xf32>
    %c0_3 = arith.constant 0 : index
    %c0_4 = arith.constant 0 : index
    %3 = vector.load %arg3[%c0_3, %c0_4] : memref<1x64xf32, #tpu.memory_space<vmem>>, vector<1x64xf32>
    %4 = vector.broadcast %3 : vector<1x64xf32> to vector<200x64xf32>
    %5 = arith.addf %2, %4 : vector<200x64xf32>
    %c0_5 = arith.constant 0 : index
    %c0_6 = arith.constant 0 : index
    %6 = vector.load %arg4[%c0_5, %c0_6] : memref<1x64xf32, #tpu.memory_space<vmem>>, vector<1x64xf32>
    %c0_7 = arith.constant 0 : index
    %c0_8 = arith.constant 0 : index
    %7 = vector.load %arg5[%c0_7, %c0_8] : memref<1x64xf32, #tpu.memory_space<vmem>>, vector<1x64xf32>
    %cst_9 = arith.constant dense<0.000000e+00> : vector<200xf32>
    %8 = vector.multi_reduction <add>, %5, %cst_9 [1] : vector<200x64xf32> to vector<200xf32>
    %9 = vector.shape_cast %8 : vector<200xf32> to vector<200x1xf32>
    %cst_10 = arith.constant 6.400000e+01 : f32
    %10 = vector.broadcast %cst_10 : f32 to vector<200x1xf32>
    %11 = arith.divf %9, %10 : vector<200x1xf32>
    %12 = vector.broadcast %11 : vector<200x1xf32> to vector<200x64xf32>
    %13 = arith.subf %5, %12 : vector<200x64xf32>
    %14 = arith.mulf %13, %13 : vector<200x64xf32>
    %cst_11 = arith.constant dense<0.000000e+00> : vector<200xf32>
    %15 = vector.multi_reduction <add>, %14, %cst_11 [1] : vector<200x64xf32> to vector<200xf32>
    %16 = vector.shape_cast %15 : vector<200xf32> to vector<200x1xf32>
    %cst_12 = arith.constant 6.400000e+01 : f32
    %17 = vector.broadcast %cst_12 : f32 to vector<200x1xf32>
    %18 = arith.divf %16, %17 : vector<200x1xf32>
    %cst_13 = arith.constant 9.99999974E-6 : f32
    %19 = vector.broadcast %cst_13 : f32 to vector<200x1xf32>
    %20 = arith.addf %18, %19 : vector<200x1xf32>
    %21 = math.rsqrt %20 : vector<200x1xf32>
    %22 = vector.broadcast %21 : vector<200x1xf32> to vector<200x64xf32>
    %23 = arith.mulf %13, %22 : vector<200x64xf32>
    %24 = vector.broadcast %6 : vector<1x64xf32> to vector<200x64xf32>
    %25 = arith.mulf %23, %24 : vector<200x64xf32>
    %26 = vector.broadcast %7 : vector<1x64xf32> to vector<200x64xf32>
    %27 = arith.addf %25, %26 : vector<200x64xf32>
    %cst_14 = arith.constant 0.000000e+00 : f32
    %28 = vector.broadcast %cst_14 : f32 to vector<200x64xf32>
    %29 = arith.maximumf %27, %28 : vector<200x64xf32>
    %c0_15 = arith.constant 0 : index
    %c0_16 = arith.constant 0 : index
    %30 = vector.load %arg6[%c0_15, %c0_16] : memref<64x32xf32, #tpu.memory_space<vmem>>, vector<64x32xf32>
    %cst_17 = arith.constant dense<0.000000e+00> : vector<200x32xf32>
    %31 = tpu.matmul %29, %30, %cst_17 {dimension_numbers = #tpu.dot_dimension_numbers<[1], [0], [0], [1], [0, 0, 1, 1], [], []>} : vector<200x64xf32>, vector<64x32xf32>, vector<200x32xf32> -> vector<200x32xf32>
    %c0_18 = arith.constant 0 : index
    %c0_19 = arith.constant 0 : index
    %32 = vector.load %arg7[%c0_18, %c0_19] : memref<1x32xf32, #tpu.memory_space<vmem>>, vector<1x32xf32>
    %33 = vector.broadcast %32 : vector<1x32xf32> to vector<200x32xf32>
    %34 = arith.addf %31, %33 : vector<200x32xf32>
    %c0_20 = arith.constant 0 : index
    %c0_21 = arith.constant 0 : index
    %35 = vector.load %arg8[%c0_20, %c0_21] : memref<1x32xf32, #tpu.memory_space<vmem>>, vector<1x32xf32>
    %c0_22 = arith.constant 0 : index
    %c0_23 = arith.constant 0 : index
    %36 = vector.load %arg9[%c0_22, %c0_23] : memref<1x32xf32, #tpu.memory_space<vmem>>, vector<1x32xf32>
    %cst_24 = arith.constant dense<0.000000e+00> : vector<200xf32>
    %37 = vector.multi_reduction <add>, %34, %cst_24 [1] : vector<200x32xf32> to vector<200xf32>
    %38 = vector.shape_cast %37 : vector<200xf32> to vector<200x1xf32>
    %cst_25 = arith.constant 3.200000e+01 : f32
    %39 = vector.broadcast %cst_25 : f32 to vector<200x1xf32>
    %40 = arith.divf %38, %39 : vector<200x1xf32>
    %41 = vector.broadcast %40 : vector<200x1xf32> to vector<200x32xf32>
    %42 = arith.subf %34, %41 : vector<200x32xf32>
    %43 = arith.mulf %42, %42 : vector<200x32xf32>
    %cst_26 = arith.constant dense<0.000000e+00> : vector<200xf32>
    %44 = vector.multi_reduction <add>, %43, %cst_26 [1] : vector<200x32xf32> to vector<200xf32>
    %45 = vector.shape_cast %44 : vector<200xf32> to vector<200x1xf32>
    %cst_27 = arith.constant 3.200000e+01 : f32
    %46 = vector.broadcast %cst_27 : f32 to vector<200x1xf32>
    %47 = arith.divf %45, %46 : vector<200x1xf32>
    %cst_28 = arith.constant 9.99999974E-6 : f32
    %48 = vector.broadcast %cst_28 : f32 to vector<200x1xf32>
    %49 = arith.addf %47, %48 : vector<200x1xf32>
    %50 = math.rsqrt %49 : vector<200x1xf32>
    %51 = vector.broadcast %50 : vector<200x1xf32> to vector<200x32xf32>
    %52 = arith.mulf %42, %51 : vector<200x32xf32>
    %53 = vector.broadcast %35 : vector<1x32xf32> to vector<200x32xf32>
    %54 = arith.mulf %52, %53 : vector<200x32xf32>
    %55 = vector.broadcast %36 : vector<1x32xf32> to vector<200x32xf32>
    %56 = arith.addf %54, %55 : vector<200x32xf32>
    %cst_29 = arith.constant 0.000000e+00 : f32
    %57 = vector.broadcast %cst_29 : f32 to vector<200x32xf32>
    %58 = arith.maximumf %56, %57 : vector<200x32xf32>
    %c0_30 = arith.constant 0 : index
    %c0_31 = arith.constant 0 : index
    %59 = vector.load %arg10[%c0_30, %c0_31] : memref<200x32xf32, #tpu.memory_space<vmem>>, vector<200x32xf32>
    tpu.vector_store %arg10[%c0_30, %c0_31], %58 {strides = array<i32>} : memref<200x32xf32, #tpu.memory_space<vmem>>, vector<200x32xf32>,
    return
  }
  func.func @transform_0(%arg0: i32) -> (i32, i32) {
    %c0_i32 = arith.constant 0 : i32
    %c0_i32_0 = arith.constant 0 : i32
    return %arg0, %c0_i32 : i32, i32
  }
  func.func @transform_1(%arg0: i32) -> (i32, i32) {
    %c0_i32 = arith.constant 0 : i32
    %c0_i32_0 = arith.constant 0 : i32
    %c0_i32_1 = arith.constant 0 : i32
    return %c0_i32, %c0_i32_0 : i32, i32
  }
  func.func @transform_2(%arg0: i32) -> (i32, i32) {
    %c0_i32 = arith.constant 0 : i32
    %c0_i32_0 = arith.constant 0 : i32
    %c0_i32_1 = arith.constant 0 : i32
    return %c0_i32, %c0_i32_0 : i32, i32
  }
  func.func @transform_3(%arg0: i32) -> (i32, i32) {
    %c0_i32 = arith.constant 0 : i32
    %c0_i32_0 = arith.constant 0 : i32
    %c0_i32_1 = arith.constant 0 : i32
    return %c0_i32, %c0_i32_0 : i32, i32
  }
  func.func @transform_4(%arg0: i32) -> (i32, i32) {
    %c0_i32 = arith.constant 0 : i32
    %c0_i32_0 = arith.constant 0 : i32
    %c0_i32_1 = arith.constant 0 : i32
    return %c0_i32, %c0_i32_0 : i32, i32
  }
  func.func @transform_5(%arg0: i32) -> (i32, i32) {
    %c0_i32 = arith.constant 0 : i32
    %c0_i32_0 = arith.constant 0 : i32
    %c0_i32_1 = arith.constant 0 : i32
    return %c0_i32, %c0_i32_0 : i32, i32
  }
  func.func @transform_6(%arg0: i32) -> (i32, i32) {
    %c0_i32 = arith.constant 0 : i32
    %c0_i32_0 = arith.constant 0 : i32
    %c0_i32_1 = arith.constant 0 : i32
    return %c0_i32, %c0_i32_0 : i32, i32
  }
  func.func @transform_7(%arg0: i32) -> (i32, i32) {
    %c0_i32 = arith.constant 0 : i32
    %c0_i32_0 = arith.constant 0 : i32
    %c0_i32_1 = arith.constant 0 : i32
    return %c0_i32, %c0_i32_0 : i32, i32
  }
  func.func @transform_8(%arg0: i32) -> (i32, i32) {
    %c0_i32 = arith.constant 0 : i32
    %c0_i32_0 = arith.constant 0 : i32
    %c0_i32_1 = arith.constant 0 : i32
    return %c0_i32, %c0_i32_0 : i32, i32
  }
  func.func @transform_9(%arg0: i32) -> (i32, i32) {
    %c0_i32 = arith.constant 0 : i32
    %c0_i32_0 = arith.constant 0 : i32
    return %arg0, %c0_i32 : i32, i32
  }
}

</mosaic_0001>

<bundles_post_ra>
// kernel: mlp_forward.1
= control target key start
LH: loop header
LB: loop body
LE: loop exit
PB: predicated region body
PF: predicated region fallthrough
CT: control target
= control target key end

     0   :  { %v1895_v0 = vmov 0.0|0.0   ;;  %vm1896_vm0 = vmmov 0   ;;  %v1897_v4 = vmov 0.0   ;;  %vm68_vm1 = vcmask 261120   ;;  %s3067_s1 = inlined_call_operand.vmem [shape: f32[32,64], index: 1, kind: input, shape index: {}]   ;;  %s3068_s0 = inlined_call_operand.vmem [shape: f32[200,32], index: 0, kind: input, shape index: {}]   ;;  %s3069_s2 = inlined_call_operand.vmem [shape: f32[1,64], index: 2, kind: input, shape index: {}]   ;;  %s3070_s5 = inlined_call_operand.vmem [shape: f32[64,32], index: 5, kind: input, shape index: {}]   ;;  %s3071_s3 = inlined_call_operand.vmem [shape: f32[1,64], index: 3, kind: input, shape index: {}]   ;;  %s3072_s4 = inlined_call_operand.vmem [shape: f32[1,64], index: 4, kind: input, shape index: {}]   ;;  %s3073_s6 = inlined_call_operand.vmem [shape: f32[1,32], index: 6, kind: input, shape index: {}]   ;;  %s3074_s7 = inlined_call_operand.vmem [shape: f32[1,32], index: 7, kind: input, shape index: {}]   ;;  %s3075_s8 = inlined_call_operand.vmem [shape: f32[1,32], index: 8, kind: input, shape index: {}]   ;;  %s3076_s9 = inlined_call_operand.vmem [shape: f32[200,32], index: 9, kind: output, shape index: {}]  }
   0x1   :  { %1766 = vmatprep.subr.bf16.mxu0 %v1895_v0  ;;  %v57_v1 = vld [vmem:[%s3067_s1] sm:$0xff]  ;;  %v58_v2 = vld [vmem:[%s3067_s1 + $0x8] sm:$0xff]  ;;  %v59_v3 = vld [vmem:[%s3067_s1 + $0x10] sm:$0xff]  ;;  %1600 = vmatprep.mubr.msk.f32.mxu0 %vm1896_vm0, %v1897_v4  ;;  %vm336_vm2 = vcmask 523264  }
   0x2   :  { %v1767_v5 = vpack.c.bf16 %v58_v2, %v57_v1  ;;  %v60_v6 = vld [vmem:[%s3067_s1 + $0x18] sm:$0xff]  ;;  %1784 = vmatprep.subr.bf16.mxu1 %v1895_v0  ;;  %1694 = vmatprep.mubr.msk.f32.mxu1 %vm1896_vm0, %v1897_v4  ;;  %v32_v8 = vld [vmem:[%s3068_s0] sm:$0xff]  ;;  %v33_v9 = vld [vmem:[%s3068_s0 + $0x8] sm:$0xff] }
   0x3   :  { %v1770_v7 = vpack.c.bf16 %v60_v6, %v59_v3  ;;  %v34_v10 = vld [vmem:[%s3068_s0 + $0x10] sm:$0xff]  ;;  %v35_v11 = vld [vmem:[%s3068_s0 + $0x18] sm:$0xff]  ;;  %v36_v12 = vld [vmem:[%s3068_s0 + $0x20] sm:$0xff] }
   0x4   :  { %1768 = vmatpush3.bf16.msra.mxu0 %v1767_v5  ;;  %v37_v13 = vld [vmem:[%s3068_s0 + $0x28] sm:$0xff]  ;;  %v38_v14 = vld [vmem:[%s3068_s0 + $0x30] sm:$0xff]  ;;  %v39_v15 = vld [vmem:[%s3068_s0 + $0x38] sm:$0xff] }
   0x5   :  { %1769 = vmatprep.subr.bf16.mxu0 %v1895_v0  ;;  %v40_v16 = vld [vmem:[%s3068_s0 + $0x40] sm:$0xff]  ;;  %v41_v17 = vld [vmem:[%s3068_s0 + $0x48] sm:$0xff]  ;;  %v42_v18 = vld [vmem:[%s3068_s0 + $0x50] sm:$0xff] }
   0x6   :  { %v43_v19 = vld [vmem:[%s3068_s0 + $0x58] sm:$0xff]  ;;  %v44_v20 = vld [vmem:[%s3068_s0 + $0x60] sm:$0xff]  ;;  %v45_v21 = vld [vmem:[%s3068_s0 + $0x68] sm:$0xff] }
   0x7   :  { %v46_v22 = vld [vmem:[%s3068_s0 + $0x70] sm:$0xff]  ;;  %v47_v23 = vld [vmem:[%s3068_s0 + $0x78] sm:$0xff]  ;;  %v48_v24 = vld [vmem:[%s3068_s0 + $0x80] sm:$0xff] }
   0x8   :  { %1771 = vmatpush3.bf16.msra.mxu0 %v1770_v7  ;;  %v49_v25 = vld [vmem:[%s3068_s0 + $0x88] sm:$0xff]  ;;  %v50_v26 = vld [vmem:[%s3068_s0 + $0x90] sm:$0xff]  ;;  %v51_v27 = vld [vmem:[%s3068_s0 + $0x98] sm:$0xff] }
   0x9   :  { %1772 = vmatprep.subr.bf16.mxu0 %v1895_v0  ;;  %v52_v28 = vld [vmem:[%s3068_s0 + $0xa0] sm:$0xff]  ;;  %v53_v29 = vld [vmem:[%s3068_s0 + $0xa8] sm:$0xff]  ;;  %v54_v30 = vld [vmem:[%s3068_s0 + $0xb0] sm:$0xff] }
   0xa   :  { %v55_v31 = vld [vmem:[%s3068_s0 + $0xb8] sm:$0xff]  ;;  %v56_v32 = vld [vmem:[%s3068_s0 + $0xc0] sm:$0xff] }
   0xb   :  { %1601 = vmatmul.mubr.msk.f32.vlgmr.msra.gmra.mrb[0].mxu0 %vm68_vm1, %v32_v8  ;;  %v2123_v35 = vld [vmem:[%s3069_s2] ss:$0 sm:$0xff] }
   0xc   :  { %1603 = vmatprep.mubr.msk.f32.mxu0 %vm1896_vm0, %v1897_v4 }
   0xf   :  { %1604 = vmatmul.mubr.msk.f32.gmra.mrb[2].mxu0 %vm68_vm1, %v33_v9 }
  0x10   :  { %1606 = vmatprep.mubr.msk.f32.mxu0 %vm1896_vm0, %v1897_v4 }
  0x13   :  { %1607 = vmatmul.mubr.msk.f32.gmra.mrb[4].mxu0 %vm68_vm1, %v34_v10 }
  0x14   :  { %1609 = vmatprep.mubr.msk.f32.mxu0 %vm1896_vm0, %v1897_v4 }
  0x17   :  { %1610 = vmatmul.mubr.msk.f32.gmra.mrb[6].mxu0 %vm68_vm1, %v35_v11 }
  0x18   :  { %1612 = vmatprep.mubr.msk.f32.mxu0 %vm1896_vm0, %v1897_v4 }
  0x1b   :  { %1613 = vmatmul.mubr.msk.f32.gmra.mrb[8].mxu0 %vm68_vm1, %v36_v12 }
  0x1c   :  { %1615 = vmatprep.mubr.msk.f32.mxu0 %vm1896_vm0, %v1897_v4 }
  0x1f   :  { %1616 = vmatmul.mubr.msk.f32.gmra.mrb[10].mxu0 %vm68_vm1, %v37_v13 }
  0x20   :  { %1618 = vmatprep.mubr.msk.f32.mxu0 %vm1896_vm0, %v1897_v4 }
  0x23   :  { %1619 = vmatmul.mubr.msk.f32.gmra.mrb[12].mxu0 %vm68_vm1, %v38_v14 }
  0x24   :  { %1621 = vmatprep.mubr.msk.f32.mxu0 %vm1896_vm0, %v1897_v4 }
  0x27   :  { %1622 = vmatmul.mubr.msk.f32.gmra.mrb[14].mxu0 %vm68_vm1, %v39_v15 }
  0x28   :  { %1624 = vmatprep.mubr.msk.f32.mxu0 %vm1896_vm0, %v1897_v4 }
  0x2b   :  { %1625 = vmatmul.mubr.msk.f32.gmra.mrb[16].mxu0 %vm68_vm1, %v40_v16 }
  0x2c   :  { %1627 = vmatprep.mubr.msk.f32.mxu0 %vm1896_vm0, %v1897_v4 }
  0x2f   :  { %1628 = vmatmul.mubr.msk.f32.gmra.mrb[18].mxu0 %vm68_vm1, %v41_v17 }
  0x30   :  { %1630 = vmatprep.mubr.msk.f32.mxu0 %vm1896_vm0, %v1897_v4 }
  0x33   :  { %1631 = vmatmul.mubr.msk.f32.gmra.mrb[20].mxu0 %vm68_vm1, %v42_v18 }
  0x34   :  { %1633 = vmatprep.mubr.msk.f32.mxu0 %vm1896_vm0, %v1897_v4 }
  0x37   :  { %1634 = vmatmul.mubr.msk.f32.gmra.mrb[22].mxu0 %vm68_vm1, %v43_v19 }
  0x38   :  { %1636 = vmatprep.mubr.msk.f32.mxu0 %vm1896_vm0, %v1897_v4 }
  0x3b   :  { %1637 = vmatmul.mubr.msk.f32.gmra.mrb[24].mxu0 %vm68_vm1, %v44_v20 }
  0x3c   :  { %1639 = vmatprep.mubr.msk.f32.mxu0 %vm1896_vm0, %v1897_v4 }
  0x3f   :  { %1640 = vmatmul.mubr.msk.f32.gmra.mrb[26].mxu0 %vm68_vm1, %v45_v21 }
  0x40   :  { %1642 = vmatprep.mubr.msk.f32.mxu0 %vm1896_vm0, %v1897_v4 }
  0x43   :  { %1643 = vmatmul.mubr.msk.f32.gmra.mrb[28].mxu0 %vm68_vm1, %v46_v22 }
  0x44   :  { %1645 = vmatprep.mubr.msk.f32.mxu0 %vm1896_vm0, %v1897_v4 }
  0x47   :  { %1646 = vmatmul.mubr.msk.f32.gmra.mrb[30].mxu0 %vm68_vm1, %v47_v23 }
  0x48   :  { %1648 = vmatprep.mubr.msk.f32.mxu0 %vm1896_vm0, %v1897_v4 }
  0x4b   :  { %1649 = vmatmul.mubr.msk.f32.gmra.mrb[32].mxu0 %vm68_vm1, %v48_v24 }
  0x4c   :  { %1651 = vmatprep.mubr.msk.f32.mxu0 %vm1896_vm0, %v1897_v4 }
  0x4f   :  { %1652 = vmatmul.mubr.msk.f32.gmra.mrb[34].mxu0 %vm68_vm1, %v49_v25 }
  0x50   :  { %1654 = vmatprep.mubr.msk.f32.mxu0 %vm1896_vm0, %v1897_v4 }
  0x53   :  { %1655 = vmatmul.mubr.msk.f32.gmra.mrb[36].mxu0 %vm68_vm1, %v50_v26 }
  0x54   :  { %1657 = vmatprep.mubr.msk.f32.mxu0 %vm1896_vm0, %v1897_v4 }
  0x57   :  { %1658 = vmatmul.mubr.msk.f32.gmra.mrb[38].mxu0 %vm68_vm1, %v51_v27 }
  0x58   :  { %1660 = vmatprep.mubr.msk.f32.mxu0 %vm1896_vm0, %v1897_v4 }
  0x5b   :  { %1661 = vmatmul.mubr.msk.f32.gmra.mrb[40].mxu0 %vm68_vm1, %v52_v28 }
  0x5c   :  { %1663 = vmatprep.mubr.msk.f32.mxu0 %vm1896_vm0, %v1897_v4 }
  0x5f   :  { %1664 = vmatmul.mubr.msk.f32.gmra.mrb[42].mxu0 %vm68_vm1, %v53_v29 }
  0x60   :  { %1666 = vmatprep.mubr.msk.f32.mxu0 %vm1896_vm0, %v1897_v4 }
  0x63   :  { %1667 = vmatmul.mubr.msk.f32.gmra.mrb[44].mxu0 %vm68_vm1, %v54_v30 }
  0x64   :  { %1669 = vmatprep.mubr.msk.f32.mxu0 %vm1896_vm0, %v1897_v4 }
  0x67   :  { %1670 = vmatmul.mubr.msk.f32.gmra.mrb[46].mxu0 %vm68_vm1, %v55_v31 }
  0x68   :  { %1672 = vmatprep.mubr.msk.f32.mxu0 %vm1896_vm0, %v1897_v4 }
  0x6b   :  { %1673 = vmatmul.mubr.msk.f32.gmra.mrb[48].mxu0 %vm68_vm1, %v56_v32 }
  0x6c   :  { %1691 = vmatprep.mubr.msk.f32.mxu0 %vm1896_vm0, %v1897_v4 }
  0xde   :  { %v2118_v33 = vpop.f32.mrb[0].mxu0 }
  0xdf   :  { %v1602_v34 = vpop.f32.mrb[1].mxu0 }
  0xe2   :  { %v215_v36 = vpop.f32.mrb[2].mxu0 }
  0xe3   :  { %v2126_v37 = vadd.f32 %v2123_v35, %v215_v36  ;;  %v1605_v38 = vpop.f32.mrb[3].mxu0 }
  0xe5   :  { %v340_v39 = vsel %vm336_vm2, %v2126_v37, 0.0 }
  0xe6   :  { %341 = vadd.xlane.f32.xlu0 %v340_v39  ;;  %v220_v40 = vpop.f32.mrb[4].mxu0 }
  0xe7   :  { %v2131_v41 = vadd.f32 %v2123_v35, %v220_v40  ;;  %v1608_v42 = vpop.f32.mrb[5].mxu0 }
  0xe9   :  { %v343_v43 = vsel %vm336_vm2, %v2131_v41, 0.0 }
  0xea   :  { %344 = vadd.xlane.f32.xlu0 %v343_v43  ;;  %v225_v44 = vpop.f32.mrb[6].mxu0 }
  0xeb   :  { %v2136_v45 = vadd.f32 %v2123_v35, %v225_v44  ;;  %v1611_v46 = vpop.f32.mrb[7].mxu0 }
  0xed   :  { %v346_v47 = vsel %vm336_vm2, %v2136_v45, 0.0 }
  0xee   :  { %347 = vadd.xlane.f32.xlu1 %v346_v47  ;;  %v230_v48 = vpop.f32.mrb[8].mxu0 }
  0xef   :  { %v2141_v49 = vadd.f32 %v2123_v35, %v230_v48  ;;  %v1614_v50 = vpop.f32.mrb[9].mxu0 }
  0xf1   :  { %v349_v51 = vsel %vm336_vm2, %v2141_v49, 0.0 }
  0xf2   :  { %350 = vadd.xlane.f32.xlu1 %v349_v51  ;;  %v235_v52 = vpop.f32.mrb[10].mxu0 }
  0xf3   :  { %v2146_v53 = vadd.f32 %v2123_v35, %v235_v52  ;;  %v1617_v54 = vpop.f32.mrb[11].mxu0 }
  0xf5   :  { %v352_v55 = vsel %vm336_vm2, %v2146_v53, 0.0 }
  0xf6   :  { %353 = vadd.xlane.f32.xlu0 %v352_v55  ;;  %v240_v56 = vpop.f32.mrb[12].mxu0 }
  0xf7   :  { %v2151_v57 = vadd.f32 %v2123_v35, %v240_v56  ;;  %v1620_v58 = vpop.f32.mrb[13].mxu0 }
  0xf9   :  { %v355_v59 = vsel %vm336_vm2, %v2151_v57, 0.0 }
  0xfa   :  { %356 = vadd.xlane.f32.xlu1 %v355_v59  ;;  %v245_v60 = vpop.f32.mrb[14].mxu0 }
  0xfb   :  { %v2156_v61 = vadd.f32 %v2123_v35, %v245_v60  ;;  %v1623_v62 = vpop.f32.mrb[15].mxu0 }
  0xfd   :  { %v358_v63 = vsel %vm336_vm2, %v2156_v61, 0.0 }
  0xfe   :  { %359 = vadd.xlane.f32.xlu0 %v358_v63  ;;  %v250_v1 = vpop.f32.mrb[16].mxu0 }
  0xff   :  { %v2161_v2 = vadd.f32 %v2123_v35, %v250_v1  ;;  %v1626_v3 = vpop.f32.mrb[17].mxu0 }
 0x101   :  { %v361_v5 = vsel %vm336_vm2, %v2161_v2, 0.0 }
 0x102   :  { %362 = vadd.xlane.f32.xlu1 %v361_v5  ;;  %v255_v6 = vpop.f32.mrb[18].mxu0 }
 0x103   :  { %v2166_v7 = vadd.f32 %v2123_v35, %v255_v6  ;;  %v1629_v8 = vpop.f32.mrb[19].mxu0 }
 0x105   :  { %v364_v9 = vsel %vm336_vm2, %v2166_v7, 0.0 }
 0x106   :  { %365 = vadd.xlane.f32.xlu0 %v364_v9  ;;  %v260_v10 = vpop.f32.mrb[20].mxu0 }
 0x107   :  { %v2171_v11 = vadd.f32 %v2123_v35, %v260_v10  ;;  %v1632_v12 = vpop.f32.mrb[21].mxu0 }
 0x109   :  { %v367_v13 = vsel %vm336_vm2, %v2171_v11, 0.0 }
 0x10a   :  { %368 = vadd.xlane.f32.xlu1 %v367_v13  ;;  %v265_v14 = vpop.f32.mrb[22].mxu0 }
 0x10b   :  { %v2176_v15 = vadd.f32 %v2123_v35, %v265_v14  ;;  %v1635_v16 = vpop.f32.mrb[23].mxu0 }
 0x10c   :  { %v2240_v16 = vadd.f32 %v2123_v35, %v2118_v33 }
 0x10d   :  { %v370_v17 = vsel %vm336_vm2, %v2176_v15, 0.0 }
 0x10e   :  { %371 = vadd.xlane.f32.xlu0 %v370_v17  ;;  %v270_v18 = vpop.f32.mrb[24].mxu0 }
 0x10f   :  { %v2181_v19 = vadd.f32 %v2123_v35, %v270_v18  ;;  %v1638_v20 = vpop.f32.mrb[25].mxu0 }
 0x111   :  { %v373_v21 = vsel %vm336_vm2, %v2181_v19, 0.0 }
 0x112   :  { %374 = vadd.xlane.f32.xlu1 %v373_v21  ;;  %v275_v22 = vpop.f32.mrb[26].mxu0  ;;  %v337_v21 = vsel %vm336_vm2, %v2240_v16, 0.0 }
 0x113   :  { %v2186_v23 = vadd.f32 %v2123_v35, %v275_v22  ;;  %v1641_v24 = vpop.f32.mrb[27].mxu0 }
 0x115   :  { %v376_v25 = vsel %vm336_vm2, %v2186_v23, 0.0 }
 0x116   :  { %377 = vadd.xlane.f32.xlu0 %v376_v25  ;;  %v280_v26 = vpop.f32.mrb[28].mxu0 }
 0x117   :  { %v2191_v27 = vadd.f32 %v2123_v35, %v280_v26  ;;  %v1644_v28 = vpop.f32.mrb[29].mxu0 }
 0x119   :  { %v379_v29 = vsel %vm336_vm2, %v2191_v27, 0.0 }
 0x11a   :  { %380 = vadd.xlane.f32.xlu1 %v379_v29  ;;  %v285_v30 = vpop.f32.mrb[30].mxu0 }
 0x11b   :  { %v2196_v31 = vadd.f32 %v2123_v35, %v285_v30  ;;  %v1647_v32 = vpop.f32.mrb[31].mxu0 }
 0x11d   :  { %v382_v34 = vsel %vm336_vm2, %v2196_v31, 0.0 }
 0x11e   :  { %383 = vadd.xlane.f32.xlu0 %v382_v34  ;;  %v290_v36 = vpop.f32.mrb[32].mxu0 }
 0x11f   :  { %v2201_v38 = vadd.f32 %v2123_v35, %v290_v36  ;;  %v1650_v39 = vpop.f32.mrb[33].mxu0 }
 0x121   :  { %v385_v40 = vsel %vm336_vm2, %v2201_v38, 0.0 }
 0x122   :  { %386 = vadd.xlane.f32.xlu1 %v385_v40  ;;  %v295_v42 = vpop.f32.mrb[34].mxu0 }
 0x123   :  { %v2206_v43 = vadd.f32 %v2123_v35, %v295_v42  ;;  %v1653_v44 = vpop.f32.mrb[35].mxu0 }
 0x125   :  { %v388_v46 = vsel %vm336_vm2, %v2206_v43, 0.0 }
 0x126   :  { %389 = vadd.xlane.f32.xlu0 %v388_v46  ;;  %v300_v47 = vpop.f32.mrb[36].mxu0 }
 0x127   :  { %v2211_v48 = vadd.f32 %v2123_v35, %v300_v47  ;;  %v1656_v50 = vpop.f32.mrb[37].mxu0 }
 0x129   :  { %v391_v51 = vsel %vm336_vm2, %v2211_v48, 0.0 }
 0x12a   :  { %392 = vadd.xlane.f32.xlu1 %v391_v51  ;;  %v305_v52 = vpop.f32.mrb[38].mxu0 }
 0x12b   :  { %v2216_v54 = vadd.f32 %v2123_v35, %v305_v52  ;;  %v1659_v55 = vpop.f32.mrb[39].mxu0 }
 0x12d   :  { %v394_v56 = vsel %vm336_vm2, %v2216_v54, 0.0 }
 0x12e   :  { %395 = vadd.xlane.f32.xlu0 %v394_v56  ;;  %v310_v58 = vpop.f32.mrb[40].mxu0 }
 0x12f   :  { %v2221_v59 = vadd.f32 %v2123_v35, %v310_v58  ;;  %v1662_v60 = vpop.f32.mrb[41].mxu0 }
 0x131   :  { %v397_v62 = vsel %vm336_vm2, %v2221_v59, 0.0 }
 0x132   :  { %398 = vadd.xlane.f32.xlu1 %v397_v62  ;;  %v315_v63 = vpop.f32.mrb[42].mxu0 }
 0x133   :  { %v2226_v1 = vadd.f32 %v2123_v35, %v315_v63  ;;  %v1665_v3 = vpop.f32.mrb[43].mxu0 }
 0x135   :  { %v400_v5 = vsel %vm336_vm2, %v2226_v1, 0.0 }
 0x136   :  { %401 = vadd.xlane.f32.xlu1 %v400_v5  ;;  %v320_v6 = vpop.f32.mrb[44].mxu0 }
 0x137   :  { %v2231_v8 = vadd.f32 %v2123_v35, %v320_v6  ;;  %v1668_v9 = vpop.f32.mrb[45].mxu0 }
 0x138   :  { %v750_v9 = vld [vmem:[%s3070_s5] sm:$0xff] }
 0x139   :  { %v403_v10 = vsel %vm336_vm2, %v2231_v8, 0.0 }
 0x13a   :  { %404 = vadd.xlane.f32.xlu1 %v403_v10  ;;  %v325_v12 = vpop.f32.mrb[46].mxu0 }
 0x13b   :  { %v2236_v13 = vadd.f32 %v2123_v35, %v325_v12  ;;  %v1671_v14 = vpop.f32.mrb[47].mxu0 }
 0x13d   :  { %v406_v17 = vsel %vm336_vm2, %v2236_v13, 0.0 }
 0x13e   :  { %407 = vadd.xlane.f32.xlu1 %v406_v17  ;;  %v330_v18 = vpop.f32.mrb[48].mxu0 }
 0x13f   :  { %v1674_v20 = vpop.f32.mrb[49].mxu0  ;;  %v2268_v51 = vadd.f32 %v2123_v35, %v330_v18 }
 0x140   :  { %v752_v20 = vld [vmem:[%s3070_s5 + $0x10] sm:$0xff] }
 0x141   :  { %v409_v60 = vsel %vm336_vm2, %v2268_v51, 0.0 }
 0x142   :  { %338 = vadd.xlane.f32.xlu1 %v337_v21  ;;  %v753_v21 = vld [vmem:[%s3070_s5 + $0x18] sm:$0xff] }
 0x173   :  { %v342_v22 = vpop.xlane.xlu0 %341 }
 0x174   :  { %v414_v24 = vmul.f32 0.015625, %v342_v22 }
 0x176   :  { %v2247_v25 = vsub.f32 %v2126_v37, %v414_v24  ;;  %v1776_v24 = vpack.c.bf16 %v753_v21, %v752_v20 }
 0x177   :  { %v345_v26 = vpop.xlane.xlu0 %344 }
 0x178   :  { %v415_v28 = vmul.f32 0.015625, %v345_v26  ;;  %v464_v33 = vmul.f32 %v2247_v25, %v2247_v25 }
 0x17a   :  { %v2252_v29 = vsub.f32 %v2131_v41, %v415_v28  ;;  %v491_v30 = vsel %vm336_vm2, %v464_v33, 0.0 }
 0x17b   :  { %v348_v32 = vpop.xlane.xlu1 %347  ;;  %492 = vadd.xlane.f32.xlu0 %v491_v30  ;;  %v754_v30 = vld [vmem:[%s3070_s5 + $0x20] sm:$0xff] }
 0x17c   :  { %v416_v34 = vmul.f32 0.015625, %v348_v32  ;;  %v465_v36 = vmul.f32 %v2252_v29, %v2252_v29  ;;  %v755_v32 = vld [vmem:[%s3070_s5 + $0x28] sm:$0xff] }
 0x17e   :  { %v2258_v39 = vsub.f32 %v2136_v45, %v416_v34  ;;  %v494_v37 = vsel %vm336_vm2, %v465_v36, 0.0  ;;  %v1779_v36 = vpack.c.bf16 %v755_v32, %v754_v30 }
 0x17f   :  { %v351_v40 = vpop.xlane.xlu1 %350  ;;  %495 = vadd.xlane.f32.xlu0 %v494_v37 }
 0x180   :  { %v417_v42 = vmul.f32 0.015625, %v351_v40  ;;  %v466_v41 = vmul.f32 %v2258_v39, %v2258_v39 }
 0x182   :  { %v2264_v44 = vsub.f32 %v2141_v49, %v417_v42  ;;  %v497_v46 = vsel %vm336_vm2, %v466_v41, 0.0  ;;  %v756_v41 = vld [vmem:[%s3070_s5 + $0x30] sm:$0xff] }
 0x183   :  { %v354_v47 = vpop.xlane.xlu0 %353  ;;  %498 = vadd.xlane.f32.xlu0 %v497_v46  ;;  %v757_v46 = vld [vmem:[%s3070_s5 + $0x38] sm:$0xff] }
 0x184   :  { %v418_v50 = vmul.f32 0.015625, %v354_v47  ;;  %v467_v45 = vmul.f32 %v2264_v44, %v2264_v44 }
 0x186   :  { %v2273_v52 = vsub.f32 %v2146_v53, %v418_v50  ;;  %v500_v55 = vsel %vm336_vm2, %v467_v45, 0.0  ;;  %v1782_v50 = vpack.c.bf16 %v757_v46, %v756_v41 }
 0x187   :  { %v357_v56 = vpop.xlane.xlu1 %356  ;;  %501 = vadd.xlane.f32.xlu0 %v500_v55 }
 0x188   :  { %v419_v49 = vmul.f32 0.015625, %v357_v56  ;;  %v468_v58 = vmul.f32 %v2273_v52, %v2273_v52 }
 0x18a   :  { %v2281_v35 = vsub.f32 %v2151_v57, %v419_v49  ;;  %v503_v62 = vsel %vm336_vm2, %v468_v58, 0.0  ;;  %v751_v57 = vld [vmem:[%s3070_s5 + $0x8] sm:$0xff] }
 0x18b   :  { %v360_v63 = vpop.xlane.xlu0 %359  ;;  %504 = vadd.xlane.f32.xlu1 %v503_v62  ;;  %410 = vadd.xlane.f32.xlu0 %v409_v60  ;;  %v1773_v12 = vpack.c.bf16 %v751_v57, %v750_v9 }
 0x18c   :  { %v420_v53 = vmul.f32 0.015625, %v360_v63  ;;  %v469_v3 = vmul.f32 %v2281_v35, %v2281_v35 }
 0x18d   :  { %1788 = vmatpush3.bf16.msra.mxu1 %v1773_v12  ;;  %1774 = vmatpush3.bf16.msra.mxu0 %v1773_v12 }
 0x18e   :  { %v2287_v5 = vsub.f32 %v2156_v61, %v420_v53  ;;  %v506_v6 = vsel %vm336_vm2, %v469_v3, 0.0  ;;  %1785 = vmatprep.subr.bf16.mxu1 %v1895_v0  ;;  %1775 = vmatprep.subr.bf16.mxu0 %v1895_v0 }
 0x18f   :  { %v363_v10 = vpop.xlane.xlu1 %362  ;;  %507 = vadd.xlane.f32.xlu0 %v506_v6 }
 0x190   :  { %v421_v14 = vmul.f32 0.015625, %v363_v10  ;;  %v470_v17 = vmul.f32 %v2287_v5, %v2287_v5 }
 0x191   :  { %1789 = vmatpush3.bf16.msra.mxu1 %v1776_v24  ;;  %1777 = vmatpush3.bf16.msra.mxu0 %v1776_v24 }
 0x192   :  { %v2299_v61 = vsub.f32 %v2161_v2, %v421_v14  ;;  %v509_v18 = vsel %vm336_vm2, %v470_v17, 0.0  ;;  %1786 = vmatprep.subr.bf16.mxu1 %v1895_v0  ;;  %1778 = vmatprep.subr.bf16.mxu0 %v1895_v0 }
 0x193   :  { %v366_v22 = vpop.xlane.xlu0 %365  ;;  %510 = vadd.xlane.f32.xlu1 %v509_v18 }
 0x194   :  { %v422_v26 = vmul.f32 0.015625, %v366_v22  ;;  %v471_v2 = vmul.f32 %v2299_v61, %v2299_v61 }
 0x195   :  { %1790 = vmatpush3.bf16.msra.mxu1 %v1779_v36  ;;  %1780 = vmatpush3.bf16.msra.mxu0 %v1779_v36 }
 0x196   :  { %v2313_v28 = vsub.f32 %v2166_v7, %v422_v26  ;;  %v512_v33 = vsel %vm336_vm2, %v471_v2, 0.0  ;;  %1787 = vmatprep.subr.bf16.mxu1 %v1895_v0  ;;  %1781 = vmatprep.subr.bf16.mxu0 %v1895_v0 }
 0x197   :  { %v369_v34 = vpop.xlane.xlu1 %368  ;;  %513 = vadd.xlane.f32.xlu0 %v512_v33 }
 0x198   :  { %v423_v37 = vmul.f32 0.015625, %v369_v34  ;;  %v472_v7 = vmul.f32 %v2313_v28, %v2313_v28 }
 0x199   :  { %1791 = vmatpush3.bf16.msra.mxu1 %v1782_v50  ;;  %1783 = vmatpush3.bf16.msra.mxu0 %v1782_v50 }
 0x19a   :  { %v2327_v40 = vsub.f32 %v2171_v11, %v423_v37  ;;  %v515_v42 = vsel %vm336_vm2, %v472_v7, 0.0 }
 0x19b   :  { %v372_v47 = vpop.xlane.xlu0 %371  ;;  %516 = vadd.xlane.f32.xlu1 %v515_v42 }
 0x19c   :  { %v424_v45 = vmul.f32 0.015625, %v372_v47  ;;  %v473_v11 = vmul.f32 %v2327_v40, %v2327_v40 }
 0x19e   :  { %v2341_v55 = vsub.f32 %v2176_v15, %v424_v45  ;;  %v518_v56 = vsel %vm336_vm2, %v473_v11, 0.0 }
 0x19f   :  { %v375_v49 = vpop.xlane.xlu1 %374  ;;  %519 = vadd.xlane.f32.xlu0 %v518_v56 }
 0x1a0   :  { %v425_v58 = vmul.f32 0.015625, %v375_v49  ;;  %v474_v0 = vmul.f32 %v2341_v55, %v2341_v55 }
 0x1a2   :  { %v2347_v60 = vsub.f32 %v2181_v19, %v425_v58  ;;  %v521_v62 = vsel %vm336_vm2, %v474_v0, 0.0 }
 0x1a3   :  { %v378_v63 = vpop.xlane.xlu0 %377  ;;  %522 = vadd.xlane.f32.xlu1 %v521_v62 }
 0x1a4   :  { %v426_v53 = vmul.f32 0.015625, %v378_v63  ;;  %v475_v15 = vmul.f32 %v2347_v60, %v2347_v60 }
 0x1a6   :  { %v2353_v3 = vsub.f32 %v2186_v23, %v426_v53  ;;  %v524_v6 = vsel %vm336_vm2, %v475_v15, 0.0 }
 0x1a7   :  { %v381_v9 = vpop.xlane.xlu1 %380  ;;  %525 = vadd.xlane.f32.xlu0 %v524_v6 }
 0x1a8   :  { %v427_v57 = vmul.f32 0.015625, %v381_v9  ;;  %v476_v19 = vmul.f32 %v2353_v3, %v2353_v3 }
 0x1aa   :  { %v2359_v10 = vsub.f32 %v2191_v27, %v427_v57  ;;  %v527_v12 = vsel %vm336_vm2, %v476_v19, 0.0 }
 0x1ab   :  { %v384_v14 = vpop.xlane.xlu0 %383  ;;  %528 = vadd.xlane.f32.xlu1 %v527_v12 }
 0x1ac   :  { %v428_v17 = vmul.f32 0.015625, %v384_v14  ;;  %v477_v23 = vmul.f32 %v2359_v10, %v2359_v10 }
 0x1ae   :  { %v2365_v18 = vsub.f32 %v2196_v31, %v428_v17  ;;  %v530_v20 = vsel %vm336_vm2, %v477_v23, 0.0 }
 0x1af   :  { %v387_v21 = vpop.xlane.xlu1 %386  ;;  %531 = vadd.xlane.f32.xlu0 %v530_v20 }
 0x1b0   :  { %v429_v22 = vmul.f32 0.015625, %v387_v21  ;;  %v478_v27 = vmul.f32 %v2365_v18, %v2365_v18 }
 0x1b2   :  { %v2371_v24 = vsub.f32 %v2201_v38, %v429_v22  ;;  %v533_v26 = vsel %vm336_vm2, %v478_v27, 0.0 }
 0x1b3   :  { %v390_v2 = vpop.xlane.xlu0 %389  ;;  %534 = vadd.xlane.f32.xlu1 %v533_v26 }
 0x1b4   :  { %v430_v33 = vmul.f32 0.015625, %v390_v2  ;;  %v479_v31 = vmul.f32 %v2371_v24, %v2371_v24 }
 0x1b6   :  { %v2377_v30 = vsub.f32 %v2206_v43, %v430_v33  ;;  %v536_v32 = vsel %vm336_vm2, %v479_v31, 0.0 }
 0x1b7   :  { %v393_v34 = vpop.xlane.xlu1 %392  ;;  %537 = vadd.xlane.f32.xlu0 %v536_v32 }
 0x1b8   :  { %v431_v36 = vmul.f32 0.015625, %v393_v34  ;;  %v480_v38 = vmul.f32 %v2377_v30, %v2377_v30 }
 0x1ba   :  { %v2383_v37 = vsub.f32 %v2211_v48, %v431_v36  ;;  %v539_v7 = vsel %vm336_vm2, %v480_v38, 0.0 }
 0x1bb   :  { %v396_v42 = vpop.xlane.xlu0 %395  ;;  %540 = vadd.xlane.f32.xlu1 %v539_v7 }
 0x1bc   :  { %v432_v41 = vmul.f32 0.015625, %v396_v42  ;;  %v481_v43 = vmul.f32 %v2383_v37, %v2383_v37 }
 0x1be   :  { %v2389_v46 = vsub.f32 %v2216_v54, %v432_v41  ;;  %v542_v47 = vsel %vm336_vm2, %v481_v43, 0.0  ;;  %v2428_v41 = vld [vmem:[%s3071_s3] ss:$0 sm:$0xff] }
 0x1bf   :  { %v399_v50 = vpop.xlane.xlu1 %398  ;;  %543 = vadd.xlane.f32.xlu0 %v542_v47 }
 0x1c0   :  { %v433_v45 = vmul.f32 0.015625, %v399_v50  ;;  %v482_v48 = vmul.f32 %v2389_v46, %v2389_v46 }
 0x1c2   :  { %v2395_v11 = vsub.f32 %v2221_v59, %v433_v45  ;;  %v545_v56 = vsel %vm336_vm2, %v482_v48, 0.0 }
 0x1c3   :  { %v402_v49 = vpop.xlane.xlu1 %401  ;;  %546 = vadd.xlane.f32.xlu1 %v545_v56  ;;  %v2434_v56 = vld [vmem:[%s3072_s4] ss:$0 sm:$0xff] }
 0x1c4   :  { %v434_v58 = vmul.f32 0.015625, %v402_v49  ;;  %v483_v54 = vmul.f32 %v2395_v11, %v2395_v11 }
 0x1c6   :  { %v2401_v0 = vsub.f32 %v2226_v1, %v434_v58  ;;  %v548_v62 = vsel %vm336_vm2, %v483_v54, 0.0 }
 0x1c7   :  { %v405_v63 = vpop.xlane.xlu1 %404  ;;  %549 = vadd.xlane.f32.xlu0 %v548_v62 }
 0x1c8   :  { %v435_v53 = vmul.f32 0.015625, %v405_v63  ;;  %v484_v59 = vmul.f32 %v2401_v0, %v2401_v0 }
 0x1ca   :  { %v2407_v15 = vsub.f32 %v2231_v8, %v435_v53  ;;  %v551_v6 = vsel %vm336_vm2, %v484_v59, 0.0 }
 0x1cb   :  { %552 = vadd.xlane.f32.xlu1 %v551_v6  ;;  %v408_v9 = vpop.xlane.xlu1 %407 }
 0x1cc   :  { %v436_v57 = vmul.f32 0.015625, %v408_v9  ;;  %v485_v1 = vmul.f32 %v2407_v15, %v2407_v15 }
 0x1ce   :  { %v2413_v19 = vsub.f32 %v2236_v13, %v436_v57  ;;  %v554_v12 = vsel %vm336_vm2, %v485_v1, 0.0 }
 0x1cf   :  { %v339_v14 = vpop.xlane.xlu1 %338  ;;  %555 = vadd.xlane.f32.xlu0 %v554_v12 }
 0x1d0   :  { %v413_v17 = vmul.f32 0.015625, %v339_v14  ;;  %v486_v8 = vmul.f32 %v2413_v19, %v2413_v19 }
 0x1d2   :  { %v2419_v23 = vsub.f32 %v2240_v16, %v413_v17  ;;  %v557_v20 = vsel %vm336_vm2, %v486_v8, 0.0 }
 0x1d3   :  { %558 = vadd.xlane.f32.xlu1 %v557_v20 }
 0x1d4   :  { %v463_v21 = vmul.f32 %v2419_v23, %v2419_v23 }
 0x1d6   :  { %v488_v13 = vsel %vm336_vm2, %v463_v21, 0.0 }
 0x1d7   :  { %489 = vadd.xlane.f32.xlu0 %v488_v13 }
 0x208   :  { %v493_v22 = vpop.xlane.xlu0 %492 }
 0x209   :  { %v564_v27 = vmul.f32 0.015625, %v493_v22 }
 0x20b   :  { %v589_v26 = vadd.f32 1e-05, %v564_v27 }
 0x20c   :  { %v496_v2 = vpop.xlane.xlu0 %495 }
 0x20d   :  { %1795 = vrsqrt.f32 %v589_v26  ;;  %v565_v33 = vmul.f32 0.015625, %v496_v2 }
 0x20f   :  { %v590_v31 = vadd.f32 1e-05, %v565_v33 }
 0x210   :  { %v499_v32 = vpop.xlane.xlu0 %498 }
 0x211   :  { %1797 = vrsqrt.f32 %v590_v31  ;;  %v566_v16 = vmul.f32 0.015625, %v499_v32 }
 0x213   :  { %v591_v34 = vadd.f32 1e-05, %v566_v16 }
 0x214   :  { %v502_v36 = vpop.xlane.xlu0 %501 }
 0x215   :  { %1799 = vrsqrt.f32 %v591_v34  ;;  %v567_v38 = vmul.f32 0.015625, %v502_v36 }
 0x217   :  { %v1796_v7 = vpop.eup %1795  ;;  %v592_v42 = vadd.f32 1e-05, %v567_v38 }
 0x218   :  { %v505_v43 = vpop.xlane.xlu1 %504  ;;  %v411_v47 = vpop.xlane.xlu0 %410  ;;  %v639_v50 = vmul.f32 %v1796_v7, %v2247_v25 }
 0x219   :  { %1801 = vrsqrt.f32 %v592_v42  ;;  %v568_v45 = vmul.f32 0.015625, %v505_v43  ;;  %v437_v48 = vmul.f32 0.015625, %v411_v47 }
 0x21a   :  { %v670_v49 = vmul.f32 %v2428_v41, %v639_v50 }
 0x21b   :  { %v1798_v58 = vpop.eup %1797  ;;  %v593_v54 = vadd.f32 1e-05, %v568_v45  ;;  %v2438_v62 = vsub.f32 %v2268_v51, %v437_v48 }
 0x21c   :  { %v508_v63 = vpop.xlane.xlu0 %507  ;;  %v701_v53 = vadd.f32 %v2434_v56, %v670_v49  ;;  %v640_v25 = vmul.f32 %v1798_v58, %v2252_v29 }
 0x21d   :  { %1803 = vrsqrt.f32 %v593_v54  ;;  %v569_v59 = vmul.f32 0.015625, %v508_v63  ;;  %v487_v6 = vmul.f32 %v2438_v62, %v2438_v62 }
 0x21e   :  { %v726_v9 = vmax.f32 %v701_v53, 0.0  ;;  %v671_v57 = vmul.f32 %v2428_v41, %v640_v25 }
 0x21f   :  { %v1800_v1 = vpop.eup %1799  ;;  %v594_v12 = vadd.f32 1e-05, %v569_v59  ;;  %v560_v14 = vsel %vm336_vm2, %v487_v6, 0.0 }
 0x220   :  { %1695 = vmatmul.mubr.msk.f32.vlgmr.msra.gmra.mrb[0].mxu1 %vm336_vm2, %v726_v9  ;;  %v511_v51 = vpop.xlane.xlu1 %510  ;;  %561 = vadd.xlane.f32.xlu1 %v560_v14  ;;  %v702_v17 = vadd.f32 %v2434_v56, %v671_v57  ;;  %v641_v29 = vmul.f32 %v1800_v1, %v2258_v39 }
 0x221   :  { %1805 = vrsqrt.f32 %v594_v12  ;;  %v570_v8 = vmul.f32 0.015625, %v511_v51  ;;  %1697 = vmatprep.mubr.msk.f32.mxu1 %vm1896_vm0, %v1897_v4 }
 0x222   :  { %v727_v20 = vmax.f32 %v702_v17, 0.0  ;;  %v672_v21 = vmul.f32 %v2428_v41, %v641_v29 }
 0x223   :  { %v1802_v13 = vpop.eup %1801  ;;  %v595_v22 = vadd.f32 1e-05, %v570_v8 }
 0x224   :  { %1698 = vmatmul.mubr.msk.f32.gmra.mrb[2].mxu1 %vm336_vm2, %v727_v20  ;;  %v514_v27 = vpop.xlane.xlu0 %513  ;;  %v703_v26 = vadd.f32 %v2434_v56, %v672_v21  ;;  %v642_v2 = vmul.f32 %v1802_v13, %v2264_v44 }
 0x225   :  { %1807 = vrsqrt.f32 %v595_v22  ;;  %v571_v33 = vmul.f32 0.015625, %v514_v27  ;;  %1700 = vmatprep.mubr.msk.f32.mxu1 %vm1896_vm0, %v1897_v4 }
 0x226   :  { %v728_v39 = vmax.f32 %v703_v26, 0.0  ;;  %v673_v31 = vmul.f32 %v2428_v41, %v642_v2 }
 0x227   :  { %v1804_v32 = vpop.eup %1803  ;;  %v596_v16 = vadd.f32 1e-05, %v571_v33 }
 0x228   :  { %1701 = vmatmul.mubr.msk.f32.gmra.mrb[4].mxu1 %vm336_vm2, %v728_v39  ;;  %v517_v34 = vpop.xlane.xlu1 %516  ;;  %v704_v36 = vadd.f32 %v2434_v56, %v673_v31  ;;  %v643_v38 = vmul.f32 %v1804_v32, %v2273_v52 }
 0x229   :  { %1809 = vrsqrt.f32 %v596_v16  ;;  %v572_v7 = vmul.f32 0.015625, %v517_v34  ;;  %1703 = vmatprep.mubr.msk.f32.mxu1 %vm1896_vm0, %v1897_v4 }
 0x22a   :  { %v729_v44 = vmax.f32 %v704_v36, 0.0  ;;  %v674_v42 = vmul.f32 %v2428_v41, %v643_v38 }
 0x22b   :  { %v1806_v43 = vpop.eup %1805  ;;  %v597_v47 = vadd.f32 1e-05, %v572_v7 }
 0x22c   :  { %1704 = vmatmul.mubr.msk.f32.gmra.mrb[6].mxu1 %vm336_vm2, %v729_v44  ;;  %v520_v50 = vpop.xlane.xlu0 %519  ;;  %v705_v45 = vadd.f32 %v2434_v56, %v674_v42  ;;  %v644_v48 = vmul.f32 %v1806_v43, %v2281_v35 }
 0x22d   :  { %1811 = vrsqrt.f32 %v597_v47  ;;  %v573_v49 = vmul.f32 0.015625, %v520_v50  ;;  %1706 = vmatprep.mubr.msk.f32.mxu1 %vm1896_vm0, %v1897_v4 }
 0x22e   :  { %v730_v52 = vmax.f32 %v705_v45, 0.0  ;;  %v675_v58 = vmul.f32 %v2428_v41, %v644_v48 }
 0x22f   :  { %v1808_v54 = vpop.eup %1807  ;;  %v598_v63 = vadd.f32 1e-05, %v573_v49 }
 0x230   :  { %1707 = vmatmul.mubr.msk.f32.gmra.mrb[8].mxu1 %vm336_vm2, %v730_v52  ;;  %v523_v53 = vpop.xlane.xlu1 %522  ;;  %v706_v25 = vadd.f32 %v2434_v56, %v675_v58  ;;  %v645_v59 = vmul.f32 %v1808_v54, %v2287_v5 }
 0x231   :  { %1813 = vrsqrt.f32 %v598_v63  ;;  %v574_v6 = vmul.f32 0.015625, %v523_v53  ;;  %1709 = vmatprep.mubr.msk.f32.mxu1 %vm1896_vm0, %v1897_v4 }
 0x232   :  { %v731_v35 = vmax.f32 %v706_v25, 0.0  ;;  %v676_v9 = vmul.f32 %v2428_v41, %v645_v59 }
 0x233   :  { %v1810_v57 = vpop.eup %1809  ;;  %v599_v1 = vadd.f32 1e-05, %v574_v6 }
 0x234   :  { %1710 = vmatmul.mubr.msk.f32.gmra.mrb[10].mxu1 %vm336_vm2, %v731_v35  ;;  %v526_v12 = vpop.xlane.xlu0 %525  ;;  %v707_v14 = vadd.f32 %v2434_v56, %v676_v9  ;;  %v646_v51 = vmul.f32 %v1810_v57, %v2299_v61 }
 0x235   :  { %1815 = vrsqrt.f32 %v599_v1  ;;  %v575_v17 = vmul.f32 0.015625, %v526_v12  ;;  %1712 = vmatprep.mubr.msk.f32.mxu1 %vm1896_vm0, %v1897_v4 }
 0x236   :  { %v732_v5 = vmax.f32 %v707_v14, 0.0  ;;  %v677_v29 = vmul.f32 %v2428_v41, %v646_v51 }
 0x237   :  { %v1812_v8 = vpop.eup %1811  ;;  %v600_v20 = vadd.f32 1e-05, %v575_v17 }
 0x238   :  { %v529_v21 = vpop.xlane.xlu1 %528  ;;  %1713 = vmatmul.mubr.msk.f32.gmra.mrb[12].mxu1 %vm336_vm2, %v732_v5  ;;  %v708_v13 = vadd.f32 %v2434_v56, %v677_v29  ;;  %v647_v22 = vmul.f32 %v1812_v8, %v2313_v28 }
 0x239   :  { %1817 = vrsqrt.f32 %v600_v20  ;;  %v576_v27 = vmul.f32 0.015625, %v529_v21  ;;  %1715 = vmatprep.mubr.msk.f32.mxu1 %vm1896_vm0, %v1897_v4 }
 0x23a   :  { %v733_v61 = vmax.f32 %v708_v13, 0.0  ;;  %v678_v26 = vmul.f32 %v2428_v41, %v647_v22 }
 0x23b   :  { %v1814_v2 = vpop.eup %1813  ;;  %v601_v33 = vadd.f32 1e-05, %v576_v27 }
 0x23c   :  { %1716 = vmatmul.mubr.msk.f32.gmra.mrb[14].mxu1 %vm336_vm2, %v733_v61  ;;  %v532_v39 = vpop.xlane.xlu0 %531  ;;  %v709_v31 = vadd.f32 %v2434_v56, %v678_v26  ;;  %v648_v32 = vmul.f32 %v1814_v2, %v2327_v40 }
 0x23d   :  { %1819 = vrsqrt.f32 %v601_v33  ;;  %v577_v16 = vmul.f32 0.015625, %v532_v39  ;;  %1718 = vmatprep.mubr.msk.f32.mxu1 %vm1896_vm0, %v1897_v4 }
 0x23e   :  { %v734_v28 = vmax.f32 %v709_v31, 0.0  ;;  %v679_v34 = vmul.f32 %v2428_v41, %v648_v32 }
 0x23f   :  { %v1816_v36 = vpop.eup %1815  ;;  %v602_v38 = vadd.f32 1e-05, %v577_v16 }
 0x240   :  { %v535_v7 = vpop.xlane.xlu1 %534  ;;  %1719 = vmatmul.mubr.msk.f32.gmra.mrb[16].mxu1 %vm336_vm2, %v734_v28  ;;  %v710_v44 = vadd.f32 %v2434_v56, %v679_v34  ;;  %v649_v42 = vmul.f32 %v1816_v36, %v2341_v55 }
 0x241   :  { %1821 = vrsqrt.f32 %v602_v38  ;;  %v578_v43 = vmul.f32 0.015625, %v535_v7  ;;  %1721 = vmatprep.mubr.msk.f32.mxu1 %vm1896_vm0, %v1897_v4 }
 0x242   :  { %v735_v40 = vmax.f32 %v710_v44, 0.0  ;;  %v680_v47 = vmul.f32 %v2428_v41, %v649_v42 }
 0x243   :  { %v1818_v50 = vpop.eup %1817  ;;  %v603_v45 = vadd.f32 1e-05, %v578_v43 }
 0x244   :  { %1722 = vmatmul.mubr.msk.f32.gmra.mrb[18].mxu1 %vm336_vm2, %v735_v40  ;;  %v538_v48 = vpop.xlane.xlu0 %537  ;;  %v711_v49 = vadd.f32 %v2434_v56, %v680_v47  ;;  %v650_v52 = vmul.f32 %v1818_v50, %v2347_v60 }
 0x245   :  { %1823 = vrsqrt.f32 %v603_v45  ;;  %v579_v58 = vmul.f32 0.015625, %v538_v48  ;;  %1724 = vmatprep.mubr.msk.f32.mxu1 %vm1896_vm0, %v1897_v4 }
 0x246   :  { %v736_v55 = vmax.f32 %v711_v49, 0.0  ;;  %v681_v54 = vmul.f32 %v2428_v41, %v650_v52 }
 0x247   :  { %v1820_v63 = vpop.eup %1819  ;;  %v604_v53 = vadd.f32 1e-05, %v579_v58 }
 0x248   :  { %v541_v25 = vpop.xlane.xlu1 %540  ;;  %1725 = vmatmul.mubr.msk.f32.gmra.mrb[20].mxu1 %vm336_vm2, %v736_v55  ;;  %v712_v59 = vadd.f32 %v2434_v56, %v681_v54  ;;  %v651_v6 = vmul.f32 %v1820_v63, %v2353_v3 }
 0x249   :  { %1825 = vrsqrt.f32 %v604_v53  ;;  %v580_v35 = vmul.f32 0.015625, %v541_v25  ;;  %1727 = vmatprep.mubr.msk.f32.mxu1 %vm1896_vm0, %v1897_v4 }
 0x24a   :  { %v737_v60 = vmax.f32 %v712_v59, 0.0  ;;  %v682_v9 = vmul.f32 %v2428_v41, %v651_v6 }
 0x24b   :  { %v1822_v57 = vpop.eup %1821  ;;  %v605_v1 = vadd.f32 1e-05, %v580_v35 }
 0x24c   :  { %1728 = vmatmul.mubr.msk.f32.gmra.mrb[22].mxu1 %vm336_vm2, %v737_v60  ;;  %v544_v12 = vpop.xlane.xlu0 %543  ;;  %v713_v14 = vadd.f32 %v2434_v56, %v682_v9  ;;  %v652_v51 = vmul.f32 %v1822_v57, %v2359_v10 }
 0x24d   :  { %1827 = vrsqrt.f32 %v605_v1  ;;  %v581_v17 = vmul.f32 0.015625, %v544_v12  ;;  %1730 = vmatprep.mubr.msk.f32.mxu1 %vm1896_vm0, %v1897_v4 }
 0x24e   :  { %v738_v3 = vmax.f32 %v713_v14, 0.0  ;;  %v683_v5 = vmul.f32 %v2428_v41, %v652_v51 }
 0x24f   :  { %v1824_v29 = vpop.eup %1823  ;;  %v606_v8 = vadd.f32 1e-05, %v581_v17 }
 0x250   :  { %v547_v20 = vpop.xlane.xlu1 %546  ;;  %1731 = vmatmul.mubr.msk.f32.gmra.mrb[24].mxu1 %vm336_vm2, %v738_v3  ;;  %v714_v21 = vadd.f32 %v2434_v56, %v683_v5  ;;  %v653_v13 = vmul.f32 %v1824_v29, %v2365_v18 }
 0x251   :  { %1829 = vrsqrt.f32 %v606_v8  ;;  %v582_v22 = vmul.f32 0.015625, %v547_v20  ;;  %1733 = vmatprep.mubr.msk.f32.mxu1 %vm1896_vm0, %v1897_v4 }
 0x252   :  { %v739_v10 = vmax.f32 %v714_v21, 0.0  ;;  %v684_v27 = vmul.f32 %v2428_v41, %v653_v13 }
 0x253   :  { %v1826_v61 = vpop.eup %1825  ;;  %v607_v26 = vadd.f32 1e-05, %v582_v22 }
 0x254   :  { %1734 = vmatmul.mubr.msk.f32.gmra.mrb[26].mxu1 %vm336_vm2, %v739_v10  ;;  %v550_v2 = vpop.xlane.xlu0 %549  ;;  %v715_v33 = vadd.f32 %v2434_v56, %v684_v27  ;;  %v654_v39 = vmul.f32 %v1826_v61, %v2371_v24 }
 0x255   :  { %1831 = vrsqrt.f32 %v607_v26  ;;  %v583_v31 = vmul.f32 0.015625, %v550_v2  ;;  %1736 = vmatprep.mubr.msk.f32.mxu1 %vm1896_vm0, %v1897_v4 }
 0x256   :  { %v740_v18 = vmax.f32 %v715_v33, 0.0  ;;  %v685_v32 = vmul.f32 %v2428_v41, %v654_v39 }
 0x257   :  { %v1828_v16 = vpop.eup %1827  ;;  %v608_v28 = vadd.f32 1e-05, %v583_v31 }
 0x258   :  { %v553_v34 = vpop.xlane.xlu1 %552  ;;  %1737 = vmatmul.mubr.msk.f32.gmra.mrb[28].mxu1 %vm336_vm2, %v740_v18  ;;  %v716_v36 = vadd.f32 %v2434_v56, %v685_v32  ;;  %v655_v38 = vmul.f32 %v1828_v16, %v2377_v30 }
 0x259   :  { %1833 = vrsqrt.f32 %v608_v28  ;;  %v584_v7 = vmul.f32 0.015625, %v553_v34  ;;  %1739 = vmatprep.mubr.msk.f32.mxu1 %vm1896_vm0, %v1897_v4 }
 0x25a   :  { %v741_v24 = vmax.f32 %v716_v36, 0.0  ;;  %v686_v44 = vmul.f32 %v2428_v41, %v655_v38 }
 0x25b   :  { %v1830_v42 = vpop.eup %1829  ;;  %v609_v43 = vadd.f32 1e-05, %v584_v7 }
 0x25c   :  { %1740 = vmatmul.mubr.msk.f32.gmra.mrb[30].mxu1 %vm336_vm2, %v741_v24  ;;  %v556_v40 = vpop.xlane.xlu0 %555  ;;  %v717_v47 = vadd.f32 %v2434_v56, %v686_v44  ;;  %v656_v50 = vmul.f32 %v1830_v42, %v2383_v37 }
 0x25d   :  { %1835 = vrsqrt.f32 %v609_v43  ;;  %v585_v45 = vmul.f32 0.015625, %v556_v40  ;;  %1742 = vmatprep.mubr.msk.f32.mxu1 %vm1896_vm0, %v1897_v4 }
 0x25e   :  { %v742_v30 = vmax.f32 %v717_v47, 0.0  ;;  %v687_v48 = vmul.f32 %v2428_v41, %v656_v50 }
 0x25f   :  { %v1832_v49 = vpop.eup %1831  ;;  %v610_v52 = vadd.f32 1e-05, %v585_v45 }
 0x260   :  { %v559_v58 = vpop.xlane.xlu1 %558  ;;  %1743 = vmatmul.mubr.msk.f32.gmra.mrb[32].mxu1 %vm336_vm2, %v742_v30  ;;  %v718_v55 = vadd.f32 %v2434_v56, %v687_v48  ;;  %v657_v54 = vmul.f32 %v1832_v49, %v2389_v46 }
 0x261   :  { %1837 = vrsqrt.f32 %v610_v52  ;;  %v586_v63 = vmul.f32 0.015625, %v559_v58  ;;  %1745 = vmatprep.mubr.msk.f32.mxu1 %vm1896_vm0, %v1897_v4 }
 0x262   :  { %v743_v37 = vmax.f32 %v718_v55, 0.0  ;;  %v688_v53 = vmul.f32 %v2428_v41, %v657_v54 }
 0x263   :  { %v1834_v25 = vpop.eup %1833  ;;  %v611_v59 = vadd.f32 1e-05, %v586_v63 }
 0x264   :  { %1746 = vmatmul.mubr.msk.f32.gmra.mrb[34].mxu1 %vm336_vm2, %v743_v37  ;;  %v490_v6 = vpop.xlane.xlu0 %489  ;;  %v719_v35 = vadd.f32 %v2434_v56, %v688_v53  ;;  %v658_v60 = vmul.f32 %v1834_v25, %v2395_v11 }
 0x265   :  { %1839 = vrsqrt.f32 %v611_v59  ;;  %v563_v9 = vmul.f32 0.015625, %v490_v6  ;;  %1748 = vmatprep.mubr.msk.f32.mxu1 %vm1896_vm0, %v1897_v4 }
 0x266   :  { %v744_v46 = vmax.f32 %v719_v35, 0.0  ;;  %v689_v57 = vmul.f32 %v2428_v41, %v658_v60 }
 0x267   :  { %v1836_v1 = vpop.eup %1835  ;;  %v588_v12 = vadd.f32 1e-05, %v563_v9 }
 0x268   :  { %1749 = vmatmul.mubr.msk.f32.gmra.mrb[36].mxu1 %vm336_vm2, %v744_v46  ;;  %v720_v14 = vadd.f32 %v2434_v56, %v689_v57  ;;  %v659_v51 = vmul.f32 %v1836_v1, %v2401_v0 }
 0x269   :  { %1841 = vrsqrt.f32 %v588_v12  ;;  %1751 = vmatprep.mubr.msk.f32.mxu1 %vm1896_vm0, %v1897_v4 }
 0x26a   :  { %v745_v11 = vmax.f32 %v720_v14, 0.0  ;;  %v690_v17 = vmul.f32 %v2428_v41, %v659_v51 }
 0x26b   :  { %v1838_v3 = vpop.eup %1837 }
 0x26c   :  { %1752 = vmatmul.mubr.msk.f32.gmra.mrb[38].mxu1 %vm336_vm2, %v745_v11  ;;  %v721_v5 = vadd.f32 %v2434_v56, %v690_v17  ;;  %v660_v29 = vmul.f32 %v1838_v3, %v2407_v15 }
 0x26d   :  { %1754 = vmatprep.mubr.msk.f32.mxu1 %vm1896_vm0, %v1897_v4 }
 0x26e   :  { %v746_v8 = vmax.f32 %v721_v5, 0.0  ;;  %v691_v0 = vmul.f32 %v2428_v41, %v660_v29 }
 0x26f   :  { %v1840_v20 = vpop.eup %1839 }
 0x270   :  { %1755 = vmatmul.mubr.msk.f32.gmra.mrb[40].mxu1 %vm336_vm2, %v746_v8  ;;  %v722_v21 = vadd.f32 %v2434_v56, %v691_v0  ;;  %v661_v13 = vmul.f32 %v1840_v20, %v2413_v19 }
 0x271   :  { %1757 = vmatprep.mubr.msk.f32.mxu1 %vm1896_vm0, %v1897_v4 }
 0x272   :  { %v747_v22 = vmax.f32 %v722_v21, 0.0  ;;  %v692_v10 = vmul.f32 %v2428_v41, %v661_v13 }
 0x273   :  { %v1842_v15 = vpop.eup %1841 }
 0x274   :  { %v638_v27 = vmul.f32 %v1842_v15, %v2419_v23  ;;  %1758 = vmatmul.mubr.msk.f32.gmra.mrb[42].mxu1 %vm336_vm2, %v747_v22  ;;  %v723_v61 = vadd.f32 %v2434_v56, %v692_v10 }
 0x275   :  { %1760 = vmatprep.mubr.msk.f32.mxu1 %vm1896_vm0, %v1897_v4 }
 0x276   :  { %v669_v26 = vmul.f32 %v2428_v41, %v638_v27  ;;  %v748_v2 = vmax.f32 %v723_v61, 0.0 }
 0x278   :  { %v700_v19 = vadd.f32 %v2434_v56, %v669_v26  ;;  %1761 = vmatmul.mubr.msk.f32.gmra.mrb[44].mxu1 %vm336_vm2, %v748_v2 }
 0x279   :  { %1763 = vmatprep.mubr.msk.f32.mxu1 %vm1896_vm0, %v1897_v4  ;;  %v2590_v4 = vld [vmem:[%s3073_s6] ss:$0 sm:$0xff] }
 0x27a   :  { %v725_v33 = vmax.f32 %v700_v19, 0.0 }
 0x27c   :  { %1692 = vmatmul.mubr.msk.f32.vlgmr.msra.gmra.mrb[50].mxu0 %vm336_vm2, %v725_v33 }
 0x2ad   :  { %v562_v23 = vpop.xlane.xlu1 %561 }
 0x2ae   :  { %v587_v39 = vmul.f32 0.015625, %v562_v23 }
 0x2b0   :  { %v612_v31 = vadd.f32 1e-05, %v587_v39 }
 0x2b2   :  { %1843 = vrsqrt.f32 %v612_v31 }
 0x2bc   :  { %v1844_v18 = vpop.eup %1843 }
 0x2bd   :  { %v662_v32 = vmul.f32 %v1844_v18, %v2438_v62 }
 0x2bf   :  { %v693_v16 = vmul.f32 %v2428_v41, %v662_v32 }
 0x2c1   :  { %v724_v28 = vadd.f32 %v2434_v56, %v693_v16 }
 0x2c3   :  { %v749_v34 = vmax.f32 %v724_v28, 0.0 }
 0x2c5   :  { %1764 = vmatmul.mubr.msk.f32.gmra.mrb[46].mxu1 %vm336_vm2, %v749_v34 }
 0x2f3   :  { %v911_v36 = vpop.f32.mrb[0].mxu1 }
 0x2f4   :  { %v2593_v38 = vadd.f32 %v2590_v4, %v911_v36  ;;  %v1696_v7 = vpop.f32.mrb[1].mxu1 }
 0x2f6   :  { %v1035_v62 = vsel %vm68_vm1, %v2593_v38, 0.0 }
 0x2f7   :  { %v2597_v24 = vpop.f32.mrb[2].mxu1  ;;  %1036 = vadd.xlane.f32.xlu1 %v1035_v62 }
 0x2f8   :  { %v1699_v41 = vpop.f32.mrb[3].mxu1 }
 0x2fb   :  { %v921_v56 = vpop.f32.mrb[4].mxu1 }
 0x2fc   :  { %v2600_v44 = vadd.f32 %v2590_v4, %v921_v56  ;;  %v1702_v42 = vpop.f32.mrb[5].mxu1 }
 0x2fe   :  { %v1041_v43 = vsel %vm68_vm1, %v2600_v44, 0.0 }
 0x2ff   :  { %v2604_v40 = vpop.f32.mrb[6].mxu1  ;;  %1042 = vadd.xlane.f32.xlu1 %v1041_v43 }
 0x300   :  { %v1705_v47 = vpop.f32.mrb[7].mxu1 }
 0x303   :  { %v931_v50 = vpop.f32.mrb[8].mxu1 }
 0x304   :  { %v2607_v45 = vadd.f32 %v2590_v4, %v931_v50  ;;  %v1708_v30 = vpop.f32.mrb[9].mxu1 }
 0x306   :  { %v1047_v48 = vsel %vm68_vm1, %v2607_v45, 0.0 }
 0x307   :  { %1048 = vadd.xlane.f32.xlu1 %v1047_v48  ;;  %v2611_v49 = vpop.f32.mrb[10].mxu1  ;;  %v2667_v48 = vadd.f32 %v2590_v4, %v2597_v24 }
 0x308   :  { %v1711_v52 = vpop.f32.mrb[11].mxu1 }
 0x30b   :  { %v941_v58 = vpop.f32.mrb[12].mxu1 }
 0x30c   :  { %v2614_v55 = vadd.f32 %v2590_v4, %v941_v58  ;;  %v1714_v54 = vpop.f32.mrb[13].mxu1  ;;  %v2673_v58 = vadd.f32 %v2590_v4, %v2604_v40 }
 0x30d   :  { %v1038_v54 = vsel %vm68_vm1, %v2667_v48, 0.0 }
 0x30e   :  { %v1053_v63 = vsel %vm68_vm1, %v2614_v55, 0.0  ;;  %v1044_v24 = vsel %vm68_vm1, %v2673_v58, 0.0 }
 0x30f   :  { %1054 = vadd.xlane.f32.xlu1 %v1053_v63  ;;  %v2618_v37 = vpop.f32.mrb[14].mxu1  ;;  %v2679_v63 = vadd.f32 %v2590_v4, %v2611_v49 }
 0x310   :  { %v1717_v53 = vpop.f32.mrb[15].mxu1 }
 0x311   :  { %v2685_v53 = vadd.f32 %v2590_v4, %v2618_v37  ;;  %v1050_v40 = vsel %vm68_vm1, %v2679_v63, 0.0 }
 0x313   :  { %v951_v25 = vpop.f32.mrb[16].mxu1  ;;  %v1056_v49 = vsel %vm68_vm1, %v2685_v53, 0.0 }
 0x314   :  { %v2621_v59 = vadd.f32 %v2590_v4, %v951_v25  ;;  %v1720_v6 = vpop.f32.mrb[17].mxu1 }
 0x316   :  { %v1059_v35 = vsel %vm68_vm1, %v2621_v59, 0.0 }
 0x317   :  { %1060 = vadd.xlane.f32.xlu1 %v1059_v35  ;;  %v2625_v60 = vpop.f32.mrb[18].mxu1 }
 0x318   :  { %v1723_v9 = vpop.f32.mrb[19].mxu1  ;;  %v2691_v25 = vadd.f32 %v2590_v4, %v2625_v60 }
 0x31a   :  { %v1062_v35 = vsel %vm68_vm1, %v2691_v25, 0.0 }
 0x31b   :  { %v961_v46 = vpop.f32.mrb[20].mxu1 }
 0x31c   :  { %v2628_v57 = vadd.f32 %v2590_v4, %v961_v46  ;;  %v1726_v1 = vpop.f32.mrb[21].mxu1 }
 0x31e   :  { %v1065_v12 = vsel %vm68_vm1, %v2628_v57, 0.0 }
 0x31f   :  { %1066 = vadd.xlane.f32.xlu1 %v1065_v12  ;;  %v966_v14 = vpop.f32.mrb[22].mxu1 }
 0x320   :  { %v1729_v51 = vpop.f32.mrb[23].mxu1  ;;  %v2696_v6 = vadd.f32 %v2590_v4, %v966_v14 }
 0x322   :  { %v1068_v9 = vsel %vm68_vm1, %v2696_v6, 0.0 }
 0x323   :  { %v971_v11 = vpop.f32.mrb[24].mxu1 }
 0x324   :  { %v2633_v17 = vadd.f32 %v2590_v4, %v971_v11  ;;  %v1732_v3 = vpop.f32.mrb[25].mxu1 }
 0x326   :  { %v1071_v5 = vsel %vm68_vm1, %v2633_v17, 0.0 }
 0x327   :  { %1072 = vadd.xlane.f32.xlu1 %v1071_v5  ;;  %v976_v29 = vpop.f32.mrb[26].mxu1 }
 0x328   :  { %v1735_v8 = vpop.f32.mrb[27].mxu1  ;;  %v2701_v37 = vadd.f32 %v2590_v4, %v976_v29 }
 0x32a   :  { %v1074_v46 = vsel %vm68_vm1, %v2701_v37, 0.0 }
 0x32b   :  { %v981_v0 = vpop.f32.mrb[28].mxu1 }
 0x32c   :  { %v2638_v20 = vadd.f32 %v2590_v4, %v981_v0  ;;  %v1738_v21 = vpop.f32.mrb[29].mxu1 }
 0x32e   :  { %v1077_v13 = vsel %vm68_vm1, %v2638_v20, 0.0 }
 0x32f   :  { %1078 = vadd.xlane.f32.xlu1 %v1077_v13  ;;  %v986_v22 = vpop.f32.mrb[30].mxu1 }
 0x330   :  { %v1741_v10 = vpop.f32.mrb[31].mxu1  ;;  %v2706_v60 = vadd.f32 %v2590_v4, %v986_v22 }
 0x332   :  { %v1080_v12 = vsel %vm68_vm1, %v2706_v60, 0.0 }
 0x333   :  { %v991_v15 = vpop.f32.mrb[32].mxu1 }
 0x334   :  { %v2643_v27 = vadd.f32 %v2590_v4, %v991_v15  ;;  %v1744_v61 = vpop.f32.mrb[33].mxu1 }
 0x336   :  { %v1083_v26 = vsel %vm68_vm1, %v2643_v27, 0.0 }
 0x337   :  { %1084 = vadd.xlane.f32.xlu1 %v1083_v26  ;;  %v996_v2 = vpop.f32.mrb[34].mxu1 }
 0x338   :  { %v1747_v19 = vpop.f32.mrb[35].mxu1  ;;  %v2711_v1 = vadd.f32 %v2590_v4, %v996_v2 }
 0x33a   :  { %v1086_v51 = vsel %vm68_vm1, %v2711_v1, 0.0 }
 0x33b   :  { %v1001_v33 = vpop.f32.mrb[36].mxu1 }
 0x33c   :  { %v2648_v23 = vadd.f32 %v2590_v4, %v1001_v33  ;;  %v1750_v39 = vpop.f32.mrb[37].mxu1 }
 0x33e   :  { %v1089_v31 = vsel %vm68_vm1, %v2648_v23, 0.0 }
 0x33f   :  { %1090 = vadd.xlane.f32.xlu1 %v1089_v31  ;;  %v1006_v18 = vpop.f32.mrb[38].mxu1 }
 0x340   :  { %v1753_v32 = vpop.f32.mrb[39].mxu1  ;;  %v2716_v14 = vadd.f32 %v2590_v4, %v1006_v18 }
 0x342   :  { %v1092_v3 = vsel %vm68_vm1, %v2716_v14, 0.0 }
 0x343   :  { %v1011_v16 = vpop.f32.mrb[40].mxu1 }
 0x344   :  { %v2653_v28 = vadd.f32 %v2590_v4, %v1011_v16  ;;  %v1756_v34 = vpop.f32.mrb[41].mxu1 }
 0x346   :  { %v1095_v36 = vsel %vm68_vm1, %v2653_v28, 0.0 }
 0x347   :  { %1096 = vadd.xlane.f32.xlu1 %v1095_v36  ;;  %v1016_v7 = vpop.f32.mrb[42].mxu1 }
 0x348   :  { %v1759_v62 = vpop.f32.mrb[43].mxu1  ;;  %v2721_v11 = vadd.f32 %v2590_v4, %v1016_v7 }
 0x34a   :  { %v1098_v5 = vsel %vm68_vm1, %v2721_v11, 0.0 }
 0x34b   :  { %v1021_v41 = vpop.f32.mrb[44].mxu1 }
 0x34c   :  { %v2658_v56 = vadd.f32 %v2590_v4, %v1021_v41  ;;  %v1762_v42 = vpop.f32.mrb[45].mxu1 }
 0x34e   :  { %v1101_v43 = vsel %vm68_vm1, %v2658_v56, 0.0 }
 0x34f   :  { %1102 = vadd.xlane.f32.xlu1 %v1101_v43  ;;  %v906_v47 = vpop.f32.mrb[50].mxu0 }
 0x350   :  { %v2663_v50 = vadd.f32 %v2590_v4, %v906_v47  ;;  %v1693_v30 = vpop.f32.mrb[51].mxu0 }
 0x352   :  { %v1032_v52 = vsel %vm68_vm1, %v2663_v50, 0.0 }
 0x353   :  { %1033 = vadd.xlane.f32.xlu0 %v1032_v52 }
 0x357   :  { %1039 = vadd.xlane.f32.xlu0 %v1038_v54 }
 0x35b   :  { %1045 = vadd.xlane.f32.xlu0 %v1044_v24 }
 0x35f   :  { %1051 = vadd.xlane.f32.xlu0 %v1050_v40 }
 0x363   :  { %1057 = vadd.xlane.f32.xlu0 %v1056_v49 }
 0x367   :  { %1063 = vadd.xlane.f32.xlu0 %v1062_v35 }
 0x36b   :  { %1069 = vadd.xlane.f32.xlu0 %v1068_v9 }
 0x36f   :  { %1075 = vadd.xlane.f32.xlu0 %v1074_v46 }
 0x373   :  { %1081 = vadd.xlane.f32.xlu0 %v1080_v12 }
 0x377   :  { %1087 = vadd.xlane.f32.xlu0 %v1086_v51 }
 0x37b   :  { %1093 = vadd.xlane.f32.xlu0 %v1092_v3 }
 0x37f   :  { %1099 = vadd.xlane.f32.xlu0 %v1098_v5 }
 0x384   :  { %v1037_v29 = vpop.xlane.xlu1 %1036 }
 0x385   :  { %v1109_v8 = vmul.f32 0.03125, %v1037_v29 }
 0x387   :  { %v2728_v21 = vsub.f32 %v2593_v38, %v1109_v8 }
 0x389   :  { %v1159_v33 = vmul.f32 %v2728_v21, %v2728_v21 }
 0x38c   :  { %v1043_v0 = vpop.xlane.xlu1 %1042 }
 0x38d   :  { %v1111_v13 = vmul.f32 0.03125, %v1043_v0 }
 0x38f   :  { %v2734_v26 = vsub.f32 %v2600_v44, %v1111_v13 }
 0x391   :  { %v1161_v18 = vmul.f32 %v2734_v26, %v2734_v26 }
 0x393   :  { %v1192_v32 = vsel %vm68_vm1, %v1161_v18, 0.0 }
 0x394   :  { %v1049_v22 = vpop.xlane.xlu1 %1048 }
 0x395   :  { %v1113_v2 = vmul.f32 0.03125, %v1049_v22 }
 0x397   :  { %v2741_v38 = vsub.f32 %v2607_v45, %v1113_v2 }
 0x398   :  { %v1026_v10 = vpop.f32.mrb[46].mxu1 }
 0x399   :  { %v2731_v15 = vadd.f32 %v2590_v4, %v1026_v10  ;;  %v1765_v61 = vpop.f32.mrb[47].mxu1  ;;  %v1186_v4 = vsel %vm68_vm1, %v1159_v33, 0.0  ;;  %v1163_v16 = vmul.f32 %v2741_v38, %v2741_v38 }
 0x39b   :  { %v1104_v19 = vsel %vm68_vm1, %v2731_v15, 0.0  ;;  %v1198_v7 = vsel %vm68_vm1, %v1163_v16, 0.0 }
 0x39c   :  { %v1055_v39 = vpop.xlane.xlu1 %1054  ;;  %1105 = vadd.xlane.f32.xlu0 %v1104_v19 }
 0x39d   :  { %v1115_v31 = vmul.f32 0.03125, %v1055_v39 }
 0x39f   :  { %v2747_v44 = vsub.f32 %v2614_v55, %v1115_v31 }
 0x3a0   :  { %1187 = vadd.xlane.f32.xlu0 %v1186_v4 }
 0x3a1   :  { %v1165_v62 = vmul.f32 %v2747_v44, %v2747_v44 }
 0x3a3   :  { %v1204_v55 = vsel %vm68_vm1, %v1165_v62, 0.0 }
 0x3a4   :  { %v1061_v34 = vpop.xlane.xlu1 %1060  ;;  %1193 = vadd.xlane.f32.xlu0 %v1192_v32 }
 0x3a5   :  { %v1117_v36 = vmul.f32 0.03125, %v1061_v34 }
 0x3a7   :  { %v2753_v45 = vsub.f32 %v2621_v59, %v1117_v36 }
 0x3a8   :  { %1199 = vadd.xlane.f32.xlu0 %v1198_v7 }
 0x3a9   :  { %v1167_v41 = vmul.f32 %v2753_v45, %v2753_v45 }
 0x3ab   :  { %v1210_v59 = vsel %vm68_vm1, %v1167_v41, 0.0 }
 0x3ac   :  { %v1067_v42 = vpop.xlane.xlu1 %1066  ;;  %1205 = vadd.xlane.f32.xlu0 %v1204_v55 }
 0x3ad   :  { %v1119_v43 = vmul.f32 0.03125, %v1067_v42 }
 0x3af   :  { %v2762_v47 = vsub.f32 %v2628_v57, %v1119_v43 }
 0x3b0   :  { %1211 = vadd.xlane.f32.xlu0 %v1210_v59 }
 0x3b1   :  { %v1169_v30 = vmul.f32 %v2762_v47, %v2762_v47 }
 0x3b3   :  { %v1216_v52 = vsel %vm68_vm1, %v1169_v30, 0.0 }
 0x3b4   :  { %v1073_v54 = vpop.xlane.xlu1 %1072  ;;  %1217 = vadd.xlane.f32.xlu0 %v1216_v52 }
 0x3b5   :  { %v1121_v24 = vmul.f32 0.03125, %v1073_v54 }
 0x3b7   :  { %v2769_v40 = vsub.f32 %v2633_v17, %v1121_v24 }
 0x3b9   :  { %v1171_v49 = vmul.f32 %v2769_v40, %v2769_v40 }
 0x3bb   :  { %v1222_v57 = vsel %vm68_vm1, %v1171_v49, 0.0 }
 0x3bc   :  { %v1079_v35 = vpop.xlane.xlu1 %1078  ;;  %1223 = vadd.xlane.f32.xlu0 %v1222_v57 }
 0x3bd   :  { %v1123_v9 = vmul.f32 0.03125, %v1079_v35 }
 0x3bf   :  { %v2775_v46 = vsub.f32 %v2638_v20, %v1123_v9 }
 0x3c1   :  { %v1173_v12 = vmul.f32 %v2775_v46, %v2775_v46 }
 0x3c3   :  { %v1228_v51 = vsel %vm68_vm1, %v1173_v12, 0.0 }
 0x3c4   :  { %v1085_v3 = vpop.xlane.xlu1 %1084  ;;  %1229 = vadd.xlane.f32.xlu0 %v1228_v51 }
 0x3c5   :  { %v1125_v17 = vmul.f32 0.03125, %v1085_v3 }
 0x3c7   :  { %v2781_v5 = vsub.f32 %v2643_v27, %v1125_v17 }
 0x3c9   :  { %v1175_v29 = vmul.f32 %v2781_v5, %v2781_v5 }
 0x3cb   :  { %v1234_v8 = vsel %vm68_vm1, %v1175_v29, 0.0 }
 0x3cc   :  { %v1091_v0 = vpop.xlane.xlu1 %1090  ;;  %1235 = vadd.xlane.f32.xlu0 %v1234_v8 }
 0x3cd   :  { %v1127_v20 = vmul.f32 0.03125, %v1091_v0 }
 0x3cf   :  { %v2787_v13 = vsub.f32 %v2648_v23, %v1127_v20 }
 0x3d1   :  { %v1177_v22 = vmul.f32 %v2787_v13, %v2787_v13 }
 0x3d3   :  { %v1240_v10 = vsel %vm68_vm1, %v1177_v22, 0.0 }
 0x3d4   :  { %v1097_v61 = vpop.xlane.xlu1 %1096  ;;  %1241 = vadd.xlane.f32.xlu0 %v1240_v10 }
 0x3d5   :  { %v1129_v27 = vmul.f32 0.03125, %v1097_v61 }
 0x3d7   :  { %v2793_v2 = vsub.f32 %v2653_v28, %v1129_v27 }
 0x3d9   :  { %v1179_v19 = vmul.f32 %v2793_v2, %v2793_v2 }
 0x3db   :  { %v1246_v33 = vsel %vm68_vm1, %v1179_v19, 0.0 }
 0x3dc   :  { %v1103_v39 = vpop.xlane.xlu1 %1102  ;;  %1247 = vadd.xlane.f32.xlu0 %v1246_v33 }
 0x3dd   :  { %v1131_v23 = vmul.f32 0.03125, %v1103_v39 }
 0x3df   :  { %v2799_v31 = vsub.f32 %v2658_v56, %v1131_v23 }
 0x3e0   :  { %v1034_v4 = vpop.xlane.xlu0 %1033 }
 0x3e1   :  { %v1108_v18 = vmul.f32 0.03125, %v1034_v4  ;;  %v1181_v32 = vmul.f32 %v2799_v31, %v2799_v31 }
 0x3e3   :  { %v2804_v16 = vsub.f32 %v2663_v50, %v1108_v18  ;;  %v1252_v28 = vsel %vm68_vm1, %v1181_v32, 0.0 }
 0x3e4   :  { %1253 = vadd.xlane.f32.xlu0 %v1252_v28  ;;  %v1040_v34 = vpop.xlane.xlu0 %1039 }
 0x3e5   :  { %v1110_v36 = vmul.f32 0.03125, %v1040_v34  ;;  %v1158_v7 = vmul.f32 %v2804_v16, %v2804_v16 }
 0x3e7   :  { %v2810_v62 = vsub.f32 %v2667_v48, %v1110_v36  ;;  %v1183_v56 = vsel %vm68_vm1, %v1158_v7, 0.0 }
 0x3e8   :  { %1184 = vadd.xlane.f32.xlu1 %v1183_v56  ;;  %v1046_v55 = vpop.xlane.xlu0 %1045 }
 0x3e9   :  { %v1112_v41 = vmul.f32 0.03125, %v1046_v55  ;;  %v1160_v50 = vmul.f32 %v2810_v62, %v2810_v62 }
 0x3eb   :  { %v2816_v42 = vsub.f32 %v2673_v58, %v1112_v41  ;;  %v1189_v43 = vsel %vm68_vm1, %v1160_v50, 0.0 }
 0x3ec   :  { %1190 = vadd.xlane.f32.xlu1 %v1189_v43  ;;  %v1052_v59 = vpop.xlane.xlu0 %1051 }
 0x3ed   :  { %v1114_v30 = vmul.f32 0.03125, %v1052_v59  ;;  %v1162_v48 = vmul.f32 %v2816_v42, %v2816_v42 }
 0x3ef   :  { %v2822_v52 = vsub.f32 %v2679_v63, %v1114_v30  ;;  %v1195_v54 = vsel %vm68_vm1, %v1162_v48, 0.0 }
 0x3f0   :  { %1196 = vadd.xlane.f32.xlu1 %v1195_v54  ;;  %v1058_v24 = vpop.xlane.xlu0 %1057 }
 0x3f1   :  { %v1116_v49 = vmul.f32 0.03125, %v1058_v24  ;;  %v1164_v58 = vmul.f32 %v2822_v52, %v2822_v52 }
 0x3f3   :  { %v2828_v57 = vsub.f32 %v2685_v53, %v1116_v49  ;;  %v1201_v35 = vsel %vm68_vm1, %v1164_v58, 0.0 }
 0x3f4   :  { %1202 = vadd.xlane.f32.xlu1 %v1201_v35  ;;  %v1064_v9 = vpop.xlane.xlu0 %1063 }
 0x3f5   :  { %v1118_v12 = vmul.f32 0.03125, %v1064_v9  ;;  %v1166_v63 = vmul.f32 %v2828_v57, %v2828_v57 }
 0x3f7   :  { %v2834_v51 = vsub.f32 %v2691_v25, %v1118_v12  ;;  %v1207_v3 = vsel %vm68_vm1, %v1166_v63, 0.0 }
 0x3f8   :  { %1208 = vadd.xlane.f32.xlu1 %v1207_v3  ;;  %v1070_v17 = vpop.xlane.xlu0 %1069 }
 0x3f9   :  { %v1120_v29 = vmul.f32 0.03125, %v1070_v17  ;;  %v1168_v53 = vmul.f32 %v2834_v51, %v2834_v51 }
 0x3fb   :  { %v2840_v8 = vsub.f32 %v2696_v6, %v1120_v29  ;;  %v1213_v0 = vsel %vm68_vm1, %v1168_v53, 0.0 }
 0x3fc   :  { %1214 = vadd.xlane.f32.xlu1 %v1213_v0  ;;  %v1076_v20 = vpop.xlane.xlu0 %1075  ;;  %v2885_v0 = vld [vmem:[%s3074_s7] ss:$0 sm:$0xff] }
 0x3fd   :  { %v1122_v22 = vmul.f32 0.03125, %v1076_v20  ;;  %v1170_v25 = vmul.f32 %v2840_v8, %v2840_v8 }
 0x3ff   :  { %v2846_v10 = vsub.f32 %v2701_v37, %v1122_v22  ;;  %v1219_v61 = vsel %vm68_vm1, %v1170_v25, 0.0 }
 0x400   :  { %1220 = vadd.xlane.f32.xlu1 %v1219_v61  ;;  %v1082_v27 = vpop.xlane.xlu0 %1081  ;;  %v2891_v61 = vld [vmem:[%s3075_s8] ss:$0 sm:$0xff] }
 0x401   :  { %v1124_v19 = vmul.f32 0.03125, %v1082_v27  ;;  %v1172_v6 = vmul.f32 %v2846_v10, %v2846_v10 }
 0x403   :  { %v2852_v33 = vsub.f32 %v2706_v60, %v1124_v19  ;;  %v1225_v39 = vsel %vm68_vm1, %v1172_v6, 0.0 }
 0x404   :  { %1226 = vadd.xlane.f32.xlu1 %v1225_v39  ;;  %v1088_v23 = vpop.xlane.xlu0 %1087 }
 0x405   :  { %v1126_v4 = vmul.f32 0.03125, %v1088_v23  ;;  %v1174_v37 = vmul.f32 %v2852_v33, %v2852_v33 }
 0x407   :  { %v2858_v18 = vsub.f32 %v2711_v1, %v1126_v4  ;;  %v1231_v32 = vsel %vm68_vm1, %v1174_v37, 0.0 }
 0x408   :  { %1232 = vadd.xlane.f32.xlu1 %v1231_v32  ;;  %v1094_v28 = vpop.xlane.xlu0 %1093 }
 0x409   :  { %v1128_v34 = vmul.f32 0.03125, %v1094_v28  ;;  %v1176_v60 = vmul.f32 %v2858_v18, %v2858_v18 }
 0x40b   :  { %v2864_v36 = vsub.f32 %v2716_v14, %v1128_v34  ;;  %v1237_v7 = vsel %vm68_vm1, %v1176_v60, 0.0 }
 0x40c   :  { %1238 = vadd.xlane.f32.xlu1 %v1237_v7  ;;  %v1100_v56 = vpop.xlane.xlu0 %1099 }
 0x40d   :  { %v1130_v55 = vmul.f32 0.03125, %v1100_v56  ;;  %v1178_v1 = vmul.f32 %v2864_v36, %v2864_v36 }
 0x40f   :  { %v2870_v41 = vsub.f32 %v2721_v11, %v1130_v55  ;;  %v1243_v50 = vsel %vm68_vm1, %v1178_v1, 0.0 }
 0x410   :  { %1244 = vadd.xlane.f32.xlu1 %v1243_v50 }
 0x411   :  { %v1180_v43 = vmul.f32 %v2870_v41, %v2870_v41 }
 0x413   :  { %v1249_v14 = vsel %vm68_vm1, %v1180_v43, 0.0 }
 0x414   :  { %1250 = vadd.xlane.f32.xlu1 %v1249_v14 }
 0x429   :  { %v1106_v59 = vpop.xlane.xlu0 %1105 }
 0x42a   :  { %v1132_v30 = vmul.f32 0.03125, %v1106_v59 }
 0x42c   :  { %v2877_v48 = vsub.f32 %v2731_v15, %v1132_v30 }
 0x42d   :  { %v1188_v54 = vpop.xlane.xlu0 %1187 }
 0x42e   :  { %v1259_v24 = vmul.f32 0.03125, %v1188_v54  ;;  %v1182_v11 = vmul.f32 %v2877_v48, %v2877_v48 }
 0x430   :  { %v1284_v49 = vadd.f32 1e-05, %v1259_v24  ;;  %v1255_v58 = vsel %vm68_vm1, %v1182_v11, 0.0 }
 0x431   :  { %1256 = vadd.xlane.f32.xlu1 %v1255_v58  ;;  %v1194_v35 = vpop.xlane.xlu0 %1193 }
 0x432   :  { %1845 = vrsqrt.f32 %v1284_v49  ;;  %v1261_v9 = vmul.f32 0.03125, %v1194_v35 }
 0x434   :  { %v1286_v12 = vadd.f32 1e-05, %v1261_v9 }
 0x435   :  { %v1200_v63 = vpop.xlane.xlu0 %1199 }
 0x436   :  { %1847 = vrsqrt.f32 %v1286_v12  ;;  %v1263_v3 = vmul.f32 0.03125, %v1200_v63 }
 0x438   :  { %v1288_v17 = vadd.f32 1e-05, %v1263_v3 }
 0x439   :  { %v1206_v29 = vpop.xlane.xlu0 %1205 }
 0x43a   :  { %1849 = vrsqrt.f32 %v1288_v17  ;;  %v1265_v15 = vmul.f32 0.03125, %v1206_v29 }
 0x43c   :  { %v1846_v53 = vpop.eup %1845  ;;  %v1290_v20 = vadd.f32 1e-05, %v1265_v15 }
 0x43d   :  { %v1334_v22 = vmul.f32 %v1846_v53, %v2728_v21  ;;  %v1212_v25 = vpop.xlane.xlu0 %1211 }
 0x43e   :  { %1851 = vrsqrt.f32 %v1290_v20  ;;  %v1267_v27 = vmul.f32 0.03125, %v1212_v25 }
 0x43f   :  { %v1365_v19 = vmul.f32 %v2885_v0, %v1334_v22 }
 0x440   :  { %v1848_v6 = vpop.eup %1847  ;;  %v1292_v39 = vadd.f32 1e-05, %v1267_v27 }
 0x441   :  { %v1396_v23 = vadd.f32 %v2891_v61, %v1365_v19  ;;  %v1336_v4 = vmul.f32 %v1848_v6, %v2734_v26  ;;  %v1218_v37 = vpop.xlane.xlu0 %1217 }
 0x442   :  { %1853 = vrsqrt.f32 %v1292_v39  ;;  %v1269_v32 = vmul.f32 0.03125, %v1218_v37 }
 0x443   :  { %v1421_v21 = vmax.f32 %v1396_v23, 0.0  ;;  %v1367_v28 = vmul.f32 %v2885_v0, %v1336_v4 }
 0x444   :  { %v1850_v34 = vpop.eup %1849  ;;  %v1294_v60 = vadd.f32 1e-05, %v1269_v32 }
 0x445   :  { %1446 = vst.msk [vmem:[%s3076_s9 + $0x8] sm:$0xff] %vm68_vm1, %v1421_v21  ;;  %v1398_v7 = vadd.f32 %v2891_v61, %v1367_v28  ;;  %v1338_v56 = vmul.f32 %v1850_v34, %v2741_v38 }
 0x446   :  { %1855 = vrsqrt.f32 %v1294_v60 }
 0x447   :  { %v1423_v55 = vmax.f32 %v1398_v7, 0.0  ;;  %v1369_v26 = vmul.f32 %v2885_v0, %v1338_v56 }
 0x448   :  { %v1852_v1 = vpop.eup %1851 }
 0x449   :  { %1448 = vst.msk [vmem:[%s3076_s9 + $0x18] sm:$0xff] %vm68_vm1, %v1423_v55  ;;  %v1400_v50 = vadd.f32 %v2891_v61, %v1369_v26  ;;  %v1340_v43 = vmul.f32 %v1852_v1, %v2747_v44  ;;  %v1224_v14 = vpop.xlane.xlu0 %1223 }
 0x44a   :  { %v1271_v59 = vmul.f32 0.03125, %v1224_v14 }
 0x44b   :  { %v1425_v30 = vmax.f32 %v1400_v50, 0.0  ;;  %v1371_v54 = vmul.f32 %v2885_v0, %v1340_v43 }
 0x44c   :  { %v1854_v38 = vpop.eup %1853  ;;  %v1296_v24 = vadd.f32 1e-05, %v1271_v59 }
 0x44d   :  { %1450 = vst.msk [vmem:[%s3076_s9 + $0x28] sm:$0xff] %vm68_vm1, %v1425_v30  ;;  %v1402_v11 = vadd.f32 %v2891_v61, %v1371_v54  ;;  %v1342_v49 = vmul.f32 %v1854_v38, %v2753_v45 }
 0x44e   :  { %1857 = vrsqrt.f32 %v1296_v24 }
 0x44f   :  { %v1427_v58 = vmax.f32 %v1402_v11, 0.0  ;;  %v1373_v44 = vmul.f32 %v2885_v0, %v1342_v49 }
 0x450   :  { %v1856_v35 = vpop.eup %1855 }
 0x451   :  { %1452 = vst.msk [vmem:[%s3076_s9 + $0x38] sm:$0xff] %vm68_vm1, %v1427_v58  ;;  %v1404_v9 = vadd.f32 %v2891_v61, %v1373_v44  ;;  %v1344_v12 = vmul.f32 %v1856_v35, %v2762_v47  ;;  %v1230_v63 = vpop.xlane.xlu0 %1229 }
 0x452   :  { %v1273_v3 = vmul.f32 0.03125, %v1230_v63 }
 0x453   :  { %v1429_v17 = vmax.f32 %v1404_v9, 0.0  ;;  %v1375_v29 = vmul.f32 %v2885_v0, %v1344_v12 }
 0x454   :  { %v1298_v45 = vadd.f32 1e-05, %v1273_v3 }
 0x455   :  { %1454 = vst.msk [vmem:[%s3076_s9 + $0x48] sm:$0xff] %vm68_vm1, %v1429_v17  ;;  %v1406_v15 = vadd.f32 %v2891_v61, %v1375_v29 }
 0x456   :  { %1859 = vrsqrt.f32 %v1298_v45 }
 0x457   :  { %v1431_v53 = vmax.f32 %v1406_v15, 0.0 }
 0x458   :  { %v1858_v20 = vpop.eup %1857 }
 0x459   :  { %1456 = vst.msk [vmem:[%s3076_s9 + $0x58] sm:$0xff] %vm68_vm1, %v1431_v53  ;;  %v1346_v47 = vmul.f32 %v1858_v20, %v2769_v40  ;;  %v1236_v22 = vpop.xlane.xlu0 %1235 }
 0x45a   :  { %v1275_v25 = vmul.f32 0.03125, %v1236_v22 }
 0x45b   :  { %v1377_v27 = vmul.f32 %v2885_v0, %v1346_v47 }
 0x45c   :  { %v1300_v19 = vadd.f32 1e-05, %v1275_v25 }
 0x45d   :  { %v1408_v6 = vadd.f32 %v2891_v61, %v1377_v27 }
 0x45e   :  { %1861 = vrsqrt.f32 %v1300_v19 }
 0x45f   :  { %v1433_v39 = vmax.f32 %v1408_v6, 0.0 }
 0x460   :  { %v1860_v23 = vpop.eup %1859 }
 0x461   :  { %1458 = vst.msk [vmem:[%s3076_s9 + $0x68] sm:$0xff] %vm68_vm1, %v1433_v39  ;;  %v1348_v4 = vmul.f32 %v1860_v23, %v2775_v46  ;;  %v1242_v37 = vpop.xlane.xlu0 %1241 }
 0x462   :  { %v1277_v32 = vmul.f32 0.03125, %v1242_v37 }
 0x463   :  { %v1379_v40 = vmul.f32 %v2885_v0, %v1348_v4 }
 0x464   :  { %v1302_v21 = vadd.f32 1e-05, %v1277_v32 }
 0x465   :  { %v1410_v28 = vadd.f32 %v2891_v61, %v1379_v40 }
 0x466   :  { %1863 = vrsqrt.f32 %v1302_v21 }
 0x467   :  { %v1435_v34 = vmax.f32 %v1410_v28, 0.0 }
 0x468   :  { %v1862_v60 = vpop.eup %1861 }
 0x469   :  { %1460 = vst.msk [vmem:[%s3076_s9 + $0x78] sm:$0xff] %vm68_vm1, %v1435_v34  ;;  %v1350_v7 = vmul.f32 %v1862_v60, %v2781_v5  ;;  %v1248_v56 = vpop.xlane.xlu0 %1247 }
 0x46a   :  { %v1279_v55 = vmul.f32 0.03125, %v1248_v56 }
 0x46b   :  { %v1381_v46 = vmul.f32 %v2885_v0, %v1350_v7 }
 0x46c   :  { %v1304_v26 = vadd.f32 1e-05, %v1279_v55 }
 0x46d   :  { %v1412_v1 = vadd.f32 %v2891_v61, %v1381_v46 }
 0x46e   :  { %1865 = vrsqrt.f32 %v1304_v26 }
 0x46f   :  { %v1437_v50 = vmax.f32 %v1412_v1, 0.0 }
 0x470   :  { %v1864_v43 = vpop.eup %1863 }
 0x471   :  { %1462 = vst.msk [vmem:[%s3076_s9 + $0x88] sm:$0xff] %vm68_vm1, %v1437_v50  ;;  %v1352_v14 = vmul.f32 %v1864_v43, %v2787_v13  ;;  %v1254_v59 = vpop.xlane.xlu0 %1253 }
 0x472   :  { %v1281_v30 = vmul.f32 0.03125, %v1254_v59 }
 0x473   :  { %v1383_v5 = vmul.f32 %v2885_v0, %v1352_v14 }
 0x474   :  { %v1306_v54 = vadd.f32 1e-05, %v1281_v30 }
 0x475   :  { %v1414_v38 = vadd.f32 %v2891_v61, %v1383_v5  ;;  %v1185_v24 = vpop.xlane.xlu1 %1184 }
 0x476   :  { %1867 = vrsqrt.f32 %v1306_v54  ;;  %v1258_v11 = vmul.f32 0.03125, %v1185_v24 }
 0x477   :  { %v1439_v49 = vmax.f32 %v1414_v38, 0.0 }
 0x478   :  { %v1866_v58 = vpop.eup %1865  ;;  %v1283_v44 = vadd.f32 1e-05, %v1258_v11 }
 0x479   :  { %1464 = vst.msk [vmem:[%s3076_s9 + $0x98] sm:$0xff] %vm68_vm1, %v1439_v49  ;;  %v1354_v13 = vmul.f32 %v1866_v58, %v2793_v2  ;;  %v1191_v35 = vpop.xlane.xlu1 %1190 }
 0x47a   :  { %1869 = vrsqrt.f32 %v1283_v44  ;;  %v1260_v9 = vmul.f32 0.03125, %v1191_v35 }
 0x47b   :  { %v1385_v12 = vmul.f32 %v2885_v0, %v1354_v13 }
 0x47c   :  { %v1285_v63 = vadd.f32 1e-05, %v1260_v9 }
 0x47d   :  { %v1416_v3 = vadd.f32 %v2891_v61, %v1385_v12  ;;  %v1197_v17 = vpop.xlane.xlu1 %1196 }
 0x47e   :  { %1871 = vrsqrt.f32 %v1285_v63  ;;  %v1262_v29 = vmul.f32 0.03125, %v1197_v17 }
 0x47f   :  { %v1441_v45 = vmax.f32 %v1416_v3, 0.0 }
 0x480   :  { %v1868_v15 = vpop.eup %1867  ;;  %v1287_v53 = vadd.f32 1e-05, %v1262_v29 }
 0x481   :  { %1466 = vst.msk [vmem:[%s3076_s9 + $0xa8] sm:$0xff] %vm68_vm1, %v1441_v45  ;;  %v1356_v2 = vmul.f32 %v1868_v15, %v2799_v31  ;;  %v1203_v20 = vpop.xlane.xlu1 %1202 }
 0x482   :  { %1873 = vrsqrt.f32 %v1287_v53  ;;  %v1264_v47 = vmul.f32 0.03125, %v1203_v20 }
 0x483   :  { %v1387_v22 = vmul.f32 %v2885_v0, %v1356_v2 }
 0x484   :  { %v1870_v25 = vpop.eup %1869  ;;  %v1289_v27 = vadd.f32 1e-05, %v1264_v47 }
 0x485   :  { %v1418_v19 = vadd.f32 %v2891_v61, %v1387_v22  ;;  %v1333_v6 = vmul.f32 %v1870_v25, %v2804_v16  ;;  %v1209_v39 = vpop.xlane.xlu1 %1208 }
 0x486   :  { %1875 = vrsqrt.f32 %v1289_v27  ;;  %v1266_v23 = vmul.f32 0.03125, %v1209_v39 }
 0x487   :  { %v1443_v4 = vmax.f32 %v1418_v19, 0.0  ;;  %v1364_v37 = vmul.f32 %v2885_v0, %v1333_v6 }
 0x488   :  { %v1872_v32 = vpop.eup %1871  ;;  %v1291_v40 = vadd.f32 1e-05, %v1266_v23 }
 0x489   :  { %1468 = vst.msk [vmem:[%s3076_s9 + $0xb8] sm:$0xff] %vm68_vm1, %v1443_v4  ;;  %v1395_v31 = vadd.f32 %v2891_v61, %v1364_v37  ;;  %v1335_v21 = vmul.f32 %v1872_v32, %v2810_v62  ;;  %v1215_v28 = vpop.xlane.xlu1 %1214 }
 0x48a   :  { %1877 = vrsqrt.f32 %v1291_v40  ;;  %v1268_v16 = vmul.f32 0.03125, %v1215_v28 }
 0x48b   :  { %v1420_v34 = vmax.f32 %v1395_v31, 0.0  ;;  %v1366_v60 = vmul.f32 %v2885_v0, %v1335_v21 }
 0x48c   :  { %v1874_v7 = vpop.eup %1873  ;;  %v1293_v56 = vadd.f32 1e-05, %v1268_v16 }
 0x48d   :  { %1445 = vst.msk [vmem:[%s3076_s9] sm:$0xff] %vm68_vm1, %v1420_v34  ;;  %v1397_v55 = vadd.f32 %v2891_v61, %v1366_v60  ;;  %v1337_v46 = vmul.f32 %v1874_v7, %v2816_v42  ;;  %v1221_v26 = vpop.xlane.xlu1 %1220 }
 0x48e   :  { %1879 = vrsqrt.f32 %v1293_v56  ;;  %v1270_v62 = vmul.f32 0.03125, %v1221_v26 }
 0x48f   :  { %v1422_v1 = vmax.f32 %v1397_v55, 0.0  ;;  %v1368_v50 = vmul.f32 %v2885_v0, %v1337_v46 }
 0x490   :  { %v1876_v43 = vpop.eup %1875  ;;  %v1295_v14 = vadd.f32 1e-05, %v1270_v62 }
 0x491   :  { %1447 = vst.msk [vmem:[%s3076_s9 + $0x10] sm:$0xff] %vm68_vm1, %v1422_v1  ;;  %v1399_v59 = vadd.f32 %v2891_v61, %v1368_v50  ;;  %v1339_v30 = vmul.f32 %v1876_v43, %v2822_v52  ;;  %v1227_v5 = vpop.xlane.xlu1 %1226 }
 0x492   :  { %1881 = vrsqrt.f32 %v1295_v14  ;;  %v1272_v42 = vmul.f32 0.03125, %v1227_v5 }
 0x493   :  { %v1424_v54 = vmax.f32 %v1399_v59, 0.0  ;;  %v1370_v38 = vmul.f32 %v2885_v0, %v1339_v30 }
 0x494   :  { %v1878_v24 = vpop.eup %1877  ;;  %v1297_v11 = vadd.f32 1e-05, %v1272_v42 }
 0x495   :  { %1449 = vst.msk [vmem:[%s3076_s9 + $0x20] sm:$0xff] %vm68_vm1, %v1424_v54  ;;  %v1401_v49 = vadd.f32 %v2891_v61, %v1370_v38  ;;  %v1341_v58 = vmul.f32 %v1878_v24, %v2828_v57  ;;  %v1233_v44 = vpop.xlane.xlu1 %1232 }
 0x496   :  { %1883 = vrsqrt.f32 %v1297_v11  ;;  %v1274_v52 = vmul.f32 0.03125, %v1233_v44 }
 0x497   :  { %v1426_v13 = vmax.f32 %v1401_v49, 0.0  ;;  %v1372_v35 = vmul.f32 %v2885_v0, %v1341_v58 }
 0x498   :  { %v1880_v9 = vpop.eup %1879  ;;  %v1299_v12 = vadd.f32 1e-05, %v1274_v52 }
 0x499   :  { %1451 = vst.msk [vmem:[%s3076_s9 + $0x30] sm:$0xff] %vm68_vm1, %v1426_v13  ;;  %v1403_v63 = vadd.f32 %v2891_v61, %v1372_v35  ;;  %v1343_v3 = vmul.f32 %v1880_v9, %v2834_v51  ;;  %v1239_v17 = vpop.xlane.xlu1 %1238 }
 0x49a   :  { %1885 = vrsqrt.f32 %v1299_v12  ;;  %v1276_v57 = vmul.f32 0.03125, %v1239_v17 }
 0x49b   :  { %v1428_v29 = vmax.f32 %v1403_v63, 0.0  ;;  %v1374_v45 = vmul.f32 %v2885_v0, %v1343_v3 }
 0x49c   :  { %v1882_v15 = vpop.eup %1881  ;;  %v1301_v53 = vadd.f32 1e-05, %v1276_v57 }
 0x49d   :  { %1453 = vst.msk [vmem:[%s3076_s9 + $0x40] sm:$0xff] %vm68_vm1, %v1428_v29  ;;  %v1405_v2 = vadd.f32 %v2891_v61, %v1374_v45  ;;  %v1345_v20 = vmul.f32 %v1882_v15, %v2840_v8  ;;  %v1245_v47 = vpop.xlane.xlu1 %1244 }
 0x49e   :  { %1887 = vrsqrt.f32 %v1301_v53  ;;  %v1278_v51 = vmul.f32 0.03125, %v1245_v47 }
 0x49f   :  { %v1430_v22 = vmax.f32 %v1405_v2, 0.0  ;;  %v1376_v25 = vmul.f32 %v2885_v0, %v1345_v20 }
 0x4a0   :  { %v1884_v27 = vpop.eup %1883  ;;  %v1303_v19 = vadd.f32 1e-05, %v1278_v51 }
 0x4a1   :  { %1455 = vst.msk [vmem:[%s3076_s9 + $0x50] sm:$0xff] %vm68_vm1, %v1430_v22  ;;  %v1407_v6 = vadd.f32 %v2891_v61, %v1376_v25  ;;  %v1347_v39 = vmul.f32 %v1884_v27, %v2846_v10  ;;  %v1251_v23 = vpop.xlane.xlu1 %1250 }
 0x4a2   :  { %1889 = vrsqrt.f32 %v1303_v19  ;;  %v1280_v8 = vmul.f32 0.03125, %v1251_v23 }
 0x4a3   :  { %v1432_v4 = vmax.f32 %v1407_v6, 0.0  ;;  %v1378_v37 = vmul.f32 %v2885_v0, %v1347_v39 }
 0x4a4   :  { %v1886_v32 = vpop.eup %1885  ;;  %v1305_v40 = vadd.f32 1e-05, %v1280_v8 }
 0x4a5   :  { %1457 = vst.msk [vmem:[%s3076_s9 + $0x60] sm:$0xff] %vm68_vm1, %v1432_v4  ;;  %v1409_v31 = vadd.f32 %v2891_v61, %v1378_v37  ;;  %v1349_v21 = vmul.f32 %v1886_v32, %v2852_v33 }
 0x4a6   :  { %1891 = vrsqrt.f32 %v1305_v40 }
 0x4a7   :  { %v1434_v28 = vmax.f32 %v1409_v31, 0.0  ;;  %v1380_v10 = vmul.f32 %v2885_v0, %v1349_v21 }
 0x4a8   :  { %v1888_v16 = vpop.eup %1887 }
 0x4a9   :  { %1459 = vst.msk [vmem:[%s3076_s9 + $0x70] sm:$0xff] %vm68_vm1, %v1434_v28  ;;  %v1411_v34 = vadd.f32 %v2891_v61, %v1380_v10  ;;  %v1351_v60 = vmul.f32 %v1888_v16, %v2858_v18 }
 0x4ab   :  { %v1436_v7 = vmax.f32 %v1411_v34, 0.0  ;;  %v1382_v56 = vmul.f32 %v2885_v0, %v1351_v60 }
 0x4ac   :  { %v1890_v55 = vpop.eup %1889 }
 0x4ad   :  { %1461 = vst.msk [vmem:[%s3076_s9 + $0x80] sm:$0xff] %vm68_vm1, %v1436_v7  ;;  %v1413_v33 = vadd.f32 %v2891_v61, %v1382_v56  ;;  %v1353_v46 = vmul.f32 %v1890_v55, %v2864_v36 }
 0x4af   :  { %v1438_v26 = vmax.f32 %v1413_v33, 0.0  ;;  %v1384_v62 = vmul.f32 %v2885_v0, %v1353_v46 }
 0x4b0   :  { %v1892_v1 = vpop.eup %1891 }
 0x4b1   :  { %1463 = vst.msk [vmem:[%s3076_s9 + $0x90] sm:$0xff] %vm68_vm1, %v1438_v26  ;;  %v1415_v18 = vadd.f32 %v2891_v61, %v1384_v62  ;;  %v1355_v50 = vmul.f32 %v1892_v1, %v2870_v41 }
 0x4b3   :  { %v1440_v43 = vmax.f32 %v1415_v18, 0.0  ;;  %v1386_v14 = vmul.f32 %v2885_v0, %v1355_v50 }
 0x4b5   :  { %1465 = vst.msk [vmem:[%s3076_s9 + $0xa0] sm:$0xff] %vm68_vm1, %v1440_v43  ;;  %v1417_v36 = vadd.f32 %v2891_v61, %v1386_v14 }
 0x4b7   :  { %v1442_v59 = vmax.f32 %v1417_v36, 0.0 }
 0x4b9   :  { %1467 = vst.msk [vmem:[%s3076_s9 + $0xb0] sm:$0xff] %vm68_vm1, %v1442_v59 }
 0x4be   :  { %v1257_v30 = vpop.xlane.xlu1 %1256 }
 0x4bf   :  { %v1282_v5 = vmul.f32 0.03125, %v1257_v30 }
 0x4c1   :  { %v1307_v42 = vadd.f32 1e-05, %v1282_v5 }
 0x4c3   :  { %1893 = vrsqrt.f32 %v1307_v42 }
 0x4cd   :  { %v1894_v41 = vpop.eup %1893 }
 0x4ce   :  { %v1357_v54 = vmul.f32 %v1894_v41, %v2877_v48 }
 0x4d0   :  { %v1388_v38 = vmul.f32 %v2885_v0, %v1357_v54 }
 0x4d2   :  { %v1419_v24 = vadd.f32 %v2891_v61, %v1388_v38 }
 0x4d4   :  { %v1444_v11 = vmax.f32 %v1419_v24, 0.0 }
 0x4d6   :  { %1469 = vst.msk [vmem:[%s3076_s9 + $0xc0] sm:$0xff] %vm68_vm1, %v1444_v11 }

</bundles_post_ra>
